<compile_context>
chip_gen: v5e
topology: v5e:2x2
jax: 0.10.0
libtpu: 0.0.40
codegen_flags: <defaults>
</compile_context>

<pallas_src>
import functools

import jax
import jax.numpy as jnp
import numpy as np
from jax.experimental import pallas as pl
from jax.experimental.pallas import tpu as pltpu

LANE = 128          # TPU lane width; 100-wide hidden layers are zero-padded to this
HIDDEN_SPLIT = 100  # concat boundary of [f, t] inside the 200-wide head input


def tfidf_transformer_kernel(
    tfidf_ref,              # [TB, FT]        bf16 activation chunk
    hs_ref,                 # [TB, ST, 4H]    bf16 activation chunk
    w1a_ref,                # [FT, 256]       bf16 weight chunk (F-tiled)
    b1a_ref,                # [1, 256]        f32
    w1b_ref, b1b_ref,       # [256, 128] bf16 (100->128 zero-padded), [1, 128] f32
    w2a_ref, b2a_ref,       # [4H, 256] bf16 (pre-scaled by 1/S),     [1, 256] f32
    w2b_ref, b2b_ref,       # [256, 128] bf16 (100->128 zero-padded), [1, 128] f32
    wfc_ref,                # [256, Cp] bf16 (head weight pre-split at row 100, re-stacked)
    bfc_ref,                # [1, Cp] f32
    out_ref,                # [TB, Cp] f32
    acc_f_ref,              # [TB, 256] f32 scratch: tf-idf branch pre-activation
    acc_t_ref,              # [TB, 256] f32 scratch: transformer branch pre-activation
    *, n_f_steps, n_s_steps,
):
    r = pl.program_id(1)
    cd = w1a_ref.dtype  # bf16 MXU input dtype; all accumulation stays f32

    @pl.when(r == 0)
    def _init():
        acc_f_ref[...] = jnp.zeros_like(acc_f_ref)
        acc_t_ref[...] = jnp.zeros_like(acc_t_ref)

    # ---- TF-IDF branch: partial [TB, FT] @ [FT, 256] along the reduction axis ----
    @pl.when(r < n_f_steps)
    def _tfidf_partial():
        acc_f_ref[...] += jnp.dot(tfidf_ref[...], w1a_ref[...],
                                  preferred_element_type=jnp.float32)

    # ---- Transformer branch: f32 sum over this S-chunk, then its w2a contribution ----
    # (1/S of the sequence mean is folded into w2a in prepare_params.)
    @pl.when(r < n_s_steps)
    def _seq_partial():
        pooled = jnp.sum(hs_ref[...].astype(jnp.float32), axis=1)      # [TB, 4H] f32
        acc_t_ref[...] += jnp.dot(pooled.astype(cd), w2a_ref[...],
                                  preferred_element_type=jnp.float32)

    # ---- Finalize on the last reduction step ------------------------------------
    @pl.when(r == pl.num_programs(1) - 1)
    def _finalize():
        f = jnp.maximum(acc_f_ref[...] + b1a_ref[...], 0.0)
        # Dropout(0.1): identity at inference.
        f = jnp.maximum(
            jnp.dot(f.astype(cd), w1b_ref[...], preferred_element_type=jnp.float32)
            + b1b_ref[...], 0.0)                                       # [TB, 128]
        t = jnp.maximum(acc_t_ref[...] + b2a_ref[...], 0.0)
        t = jnp.maximum(
            jnp.dot(t.astype(cd), w2b_ref[...], preferred_element_type=jnp.float32)
            + b2b_ref[...], 0.0)                                       # [TB, 128]
        # Head: fc(concat([f, t])) as ONE K=256 matmul (fills the 256-wide MXU).
        ft = jnp.concatenate([f.astype(cd), t.astype(cd)], axis=1)     # [TB, 256]
        out_ref[...] = (
            jnp.dot(ft, wfc_ref[...], preferred_element_type=jnp.float32)
            + bfc_ref[...]).astype(out_ref.dtype)                      # lane-dense store


def prepare_params(params, seq_len, *, weight_dtype=jnp.bfloat16):
    """Split / pad / scale / cast weights once (all free, static preprocessing)."""
    def pad2d(a, rows, cols):
        return jnp.pad(a, ((0, rows - a.shape[0]), (0, cols - a.shape[1])))

    c = params["wfc"].shape[1]
    cp = pl.cdiv(c, LANE) * LANE  # lane-dense class dimension

    w1a = params["w1a"].astype(weight_dtype)              # F rows padded in the wrapper
    b1a = params["b1a"].astype(jnp.float32)
    w1b = pad2d(params["w1b"], 256, LANE).astype(weight_dtype)
    b1b = pad2d(params["b1b"], 1, LANE).astype(jnp.float32)

    # Fold the 1/S of the sequence mean into the first transformer-branch weight.
    w2a = (params["w2a"] / jnp.float32(seq_len)).astype(weight_dtype)
    b2a = params["b2a"].astype(jnp.float32)
    w2b = pad2d(params["w2b"], 256, LANE).astype(weight_dtype)
    b2b = pad2d(params["b2b"], 1, LANE).astype(jnp.float32)

    # Pre-split the head weight at the concat boundary, pad each half 100->128 rows
    # (matching the zero-padded f/t lanes), then re-stack into one [256, Cp] weight so
    # the head is a single K=256 matmul on the 256-wide MXU.
    wfc = params["wfc"]
    wfc_f = pad2d(wfc[:HIDDEN_SPLIT, :], LANE, cp)
    wfc_t = pad2d(wfc[HIDDEN_SPLIT:, :], LANE, cp)
    wfc_stacked = jnp.concatenate([wfc_f, wfc_t], axis=0).astype(weight_dtype)
    bfc = pad2d(params["bfc"], 1, cp).astype(jnp.float32)

    return dict(w1a=w1a, b1a=b1a, w1b=w1b, b1b=b1b,
                w2a=w2a, b2a=b2a, w2b=w2b, b2b=b2b,
                wfc=wfc_stacked, bfc=bfc)


def _choose_batch_tile(batch, requested, sub):
    """Sublane-aligned batch tile; prefer >=2 grid steps so v7x's 2 TCs both get work."""
    b_aligned = max(sub, pl.cdiv(batch, sub) * sub)
    tb = max(sub, (min(requested, b_aligned) // sub) * sub)
    if pl.cdiv(b_aligned, tb) < 2 and b_aligned >= 2 * sub:
        tb = max(sub, ((b_aligned // 2) // sub) * sub)
    return tb


def tfidf_transformer_forward(tfidf_vec, hidden_states, prepared, num_classes, *,
                              batch_tile=128, f_tile=2048, s_tile=16,
                              buffer_depth=2, compute_dtype=jnp.bfloat16):
    """Fused forward pass. `prepared` is the output of prepare_params()."""
    B, F = tfidf_vec.shape
    _, S, H4 = hidden_states.shape
    Cp = prepared["wfc"].shape[1]

    # ---- Tile selection (all sweepable) --------------------------------------
    sub = 16 if np.dtype(compute_dtype).itemsize == 2 else 8   # bf16 sublane tiling
    TB = _choose_batch_tile(B, batch_tile, sub)
    Bp = pl.cdiv(B, TB) * TB

    FT = max(LANE, (min(f_tile, pl.cdiv(F, LANE) * LANE) // LANE) * LANE)
    Fp = pl.cdiv(F, FT) * FT
    n_f_steps = Fp // FT

    ST = max(sub, (min(s_tile, pl.cdiv(S, sub) * sub) // sub) * sub)
    Sp = pl.cdiv(S, ST) * ST
    n_s_steps = Sp // ST

    n_red = max(n_f_steps, n_s_steps)   # shared "arbitrary" reduction axis

    # ---- Host-side padding + bf16 pre-cast of the streamed activations -------
    # The kernel casts to bf16 before every matmul anyway, so pre-casting halves
    # HBM->VMEM bytes at the cost of one extra rounding per element.
    tfidf_p = jnp.pad(tfidf_vec.astype(compute_dtype), ((0, Bp - B), (0, Fp - F)))
    hs_p = jnp.pad(hidden_states.astype(compute_dtype),
                   ((0, Bp - B), (0, Sp - S), (0, 0)))
    w1a_p = jnp.pad(prepared["w1a"], ((0, Fp - F), (0, 0)))  # zero rows contribute 0

    # ---- BlockSpecs ------------------------------------------------------------
    def clamp(r, n):
        # When one branch has fewer reduction steps, clamp its block index (the
        # repeated block is not re-fetched; the compute is skipped via pl.when).
        return r if n == n_red else jnp.minimum(r, n - 1)

    def act_spec(shape, idx_map):
        if buffer_depth > 2:
            return pl.BlockSpec(shape, idx_map, pipeline_mode=pl.Buffered(buffer_depth))
        return pl.BlockSpec(shape, idx_map)

    tfidf_spec = act_spec((TB, FT), lambda i, r: (i, clamp(r, n_f_steps)))
    hs_spec = act_spec((TB, ST, H4), lambda i, r: (i, clamp(r, n_s_steps), 0))
    w1a_spec = pl.BlockSpec((FT, 256), lambda i, r: (clamp(r, n_f_steps), 0))
    # Small weights/biases: whole-array, VMEM-resident, un-pipelined; loaded once and
    # reused across every batch tile / reduction step.
    resident = pl.BlockSpec(memory_space=pltpu.MemorySpace.VMEM)

    resident_keys = ("b1a", "w1b", "b1b", "w2a", "b2a", "w2b", "b2b", "wfc", "bfc")
    resident_args = tuple(prepared[k] for k in resident_keys)

    # ---- Generation-aware VMEM budget ------------------------------------------
    itemsize = np.dtype(compute_dtype).itemsize
    resident_bytes = sum(int(a.size) * a.dtype.itemsize for a in resident_args)
    bufs = max(2, buffer_depth)
    streamed_bytes = bufs * (TB * FT + FT * 256 + TB * ST * H4) * itemsize
    fixed_bytes = 2 * TB * Cp * 4 + 2 * TB * 256 * 4            # out block + f32 scratch
    need = resident_bytes + streamed_bytes + fixed_bytes
    try:
        vmem_cap = getattr(pltpu.get_tpu_info(), "vmem_capacity_bytes", 64 << 20)
    except Exception:
        vmem_cap = 64 << 20                                     # conservative (v7x) fallback
    vmem_limit = max(32 << 20, min(int(need * 1.25) + (2 << 20), int(0.75 * vmem_cap)))

    kernel = functools.partial(tfidf_transformer_kernel,
                               n_f_steps=n_f_steps, n_s_steps=n_s_steps)

    out = pl.pallas_call(
        kernel,
        out_shape=jax.ShapeDtypeStruct((Bp, Cp), jnp.float32),
        grid=(Bp // TB, n_red),
        in_specs=[tfidf_spec, hs_spec, w1a_spec] + [resident] * len(resident_args),
        out_specs=pl.BlockSpec((TB, Cp), lambda i, r: (i, 0)),
        scratch_shapes=[pltpu.VMEM((TB, 256), jnp.float32),
                        pltpu.VMEM((TB, 256), jnp.float32)],
        compiler_params=pltpu.CompilerParams(
            dimension_semantics=("parallel", "arbitrary"),  # batch shards across TCs
            vmem_limit_bytes=vmem_limit,
        ),
    )(tfidf_p, hs_p, w1a_p, *resident_args)

    return out[:B, :num_classes]


def _init_params(key, n_tfidf_features, hidden_size, num_classes):
    """Deterministic synthetic parameter init (shapes follow the nn.Module __init__)."""
    ks = jax.random.split(key, 5)
    h4 = hidden_size * 4

    def lin(k, fan_in, fan_out):
        kw, kb = jax.random.split(k)
        scale = 1.0 / jnp.sqrt(jnp.float32(fan_in))
        w = jax.random.uniform(kw, (fan_in, fan_out), jnp.float32, -scale, scale)
        b = jax.random.uniform(kb, (1, fan_out), jnp.float32, -scale, scale)
        return w, b

    w1a, b1a = lin(ks[0], n_tfidf_features, 256)   # TFIDFDense.mlp[0]
    w1b, b1b = lin(ks[1], 256, 100)                # TFIDFDense.mlp[3]
    w2a, b2a = lin(ks[2], h4, 256)                 # TransformerDense.mlp[0]
    w2b, b2b = lin(ks[3], 256, 100)                # TransformerDense.mlp[3]
    wfc, bfc = lin(ks[4], 200, num_classes)        # TFIDFTransformer.fc
    return dict(w1a=w1a, b1a=b1a, w1b=w1b, b1b=b1b,
                w2a=w2a, b2a=b2a, w2b=w2b, b2b=b2b,
                wfc=wfc, bfc=bfc)


def _reference_prepared(tfidf_bf16, hs_bf16, pp):
    """Pure-JAX reference mirroring the kernel numerics (bf16 inputs/weights, f32 acc)."""
    cd = pp["w1a"].dtype
    f = jnp.dot(tfidf_bf16.astype(cd), pp["w1a"],
                preferred_element_type=jnp.float32) + pp["b1a"]
    f = jnp.maximum(f, 0.0)
    f = jnp.maximum(jnp.dot(f.astype(cd), pp["w1b"],
                            preferred_element_type=jnp.float32) + pp["b1b"], 0.0)
    pooled = jnp.sum(hs_bf16.astype(jnp.float32), axis=1)
    t = jnp.dot(pooled.astype(cd), pp["w2a"],
                preferred_element_type=jnp.float32) + pp["b2a"]
    t = jnp.maximum(t, 0.0)
    t = jnp.maximum(jnp.dot(t.astype(cd), pp["w2b"],
                            preferred_element_type=jnp.float32) + pp["b2b"], 0.0)
    ft = jnp.concatenate([f.astype(cd), t.astype(cd)], axis=1)
    return jnp.dot(ft, pp["wfc"], preferred_element_type=jnp.float32) + pp["bfc"]


def _reference_f32(tfidf_vec, hs, p):
    """Full-precision reference of the original nn.Module semantics."""
    f = jnp.maximum(tfidf_vec @ p["w1a"] + p["b1a"], 0.0)
    f = jnp.maximum(f @ p["w1b"] + p["b1b"], 0.0)
    t = jnp.maximum(jnp.mean(hs, axis=1) @ p["w2a"] + p["b2a"], 0.0)
    t = jnp.maximum(t @ p["w2b"] + p["b2b"], 0.0)
    return jnp.concatenate([f, t], axis=1) @ p["wfc"] + p["bfc"]


if __name__ == "__main__":
    # Small shapes consistent with the forward pass.
    B = 2                  # batch of texts
    F = 512                # synthetic tf-idf vocabulary size
    S = 8                  # tokenized sequence length
    HIDDEN = 32            # transformer hidden_size -> concat of last 4 states = 128
    NUM_CLASSES = 4

    key = jax.random.PRNGKey(0)
    k_tfidf, k_hs, k_params = jax.random.split(key, 3)

    # TODO(synk): TfidfVectorizer.transform, AutoTokenizer and the transformer backbone
    # are host-side / external models; their numeric outputs are synthesized here.
    tfidf_vec = jax.random.uniform(k_tfidf, (B, F), jnp.float32)
    hidden_states = jax.random.normal(k_hs, (B, S, 4 * HIDDEN), jnp.float32)

    params = _init_params(k_params, F, HIDDEN, NUM_CLASSES)
    prepared = prepare_params(params, seq_len=S)

    out = tfidf_transformer_forward(tfidf_vec, hidden_states, prepared, NUM_CLASSES)
    out = jax.block_until_ready(out)
    assert out.shape == (B, NUM_CLASSES)

    # Tight check vs. a reference with identical numerics (bf16 inputs/weights, f32 acc).
    ref_bf16 = _reference_prepared(tfidf_vec.astype(jnp.bfloat16),
                                   hidden_states.astype(jnp.bfloat16),
                                   prepared)[:B, :NUM_CLASSES]
    assert jnp.allclose(out, ref_bf16, atol=5e-3, rtol=5e-3)

    # Loose check vs. the full-f32 original-module semantics (bf16 rounding only).
    ref_f32 = _reference_f32(tfidf_vec, hidden_states, params)
    assert jnp.allclose(out, ref_f32, atol=1e-1, rtol=1e-1)

    print("KERNEL_OK")
</pallas_src>

<mosaic_0001>
module attributes {stable_mosaic.version = 11 : i64} {
  func.func @tfidf_transformer_kernel(%arg0: i32, %arg1: i32, %arg2: memref<16x512xbf16, #tpu.memory_space<vmem>>, %arg3: memref<16x16x128xbf16, #tpu.memory_space<vmem>>, %arg4: memref<512x256xbf16, #tpu.memory_space<vmem>>, %arg5: memref<1x256xf32, #tpu.memory_space<vmem>>, %arg6: memref<256x128xbf16, #tpu.memory_space<vmem>>, %arg7: memref<1x128xf32, #tpu.memory_space<vmem>>, %arg8: memref<128x256xbf16, #tpu.memory_space<vmem>>, %arg9: memref<1x256xf32, #tpu.memory_space<vmem>>, %arg10: memref<256x128xbf16, #tpu.memory_space<vmem>>, %arg11: memref<1x128xf32, #tpu.memory_space<vmem>>, %arg12: memref<256x128xbf16, #tpu.memory_space<vmem>>, %arg13: memref<1x128xf32, #tpu.memory_space<vmem>>, %arg14: memref<16x128xf32, #tpu.memory_space<vmem>>, %arg15: memref<16x256xf32, #tpu.memory_space<vmem>>, %arg16: memref<16x256xf32, #tpu.memory_space<vmem>>) attributes {dimension_semantics = [#tpu.dimension_semantics<parallel>, #tpu.dimension_semantics<arbitrary>], iteration_bounds = array<i64: 1, 1>, scalar_prefetch = 0 : i64, scratch_operands = 2 : i64, tpu.core_type = #tpu.core_type<tc>, window_params = [{transform_indices = @transform_0, window_bounds = array<i64: 16, 512>}, {transform_indices = @transform_1, window_bounds = array<i64: 16, 16, 128>}, {transform_indices = @transform_2, window_bounds = array<i64: 512, 256>}, {pipeline_mode = #tpu.pipeline_mode<synchronous>, transform_indices = @transform_3, window_bounds = array<i64: 1, 256>}, {pipeline_mode = #tpu.pipeline_mode<synchronous>, transform_indices = @transform_4, window_bounds = array<i64: 256, 128>}, {pipeline_mode = #tpu.pipeline_mode<synchronous>, transform_indices = @transform_5, window_bounds = array<i64: 1, 128>}, {pipeline_mode = #tpu.pipeline_mode<synchronous>, transform_indices = @transform_6, window_bounds = array<i64: 128, 256>}, {pipeline_mode = #tpu.pipeline_mode<synchronous>, transform_indices = @transform_7, window_bounds = array<i64: 1, 256>}, {pipeline_mode = #tpu.pipeline_mode<synchronous>, transform_indices = @transform_8, window_bounds = array<i64: 256, 128>}, {pipeline_mode = #tpu.pipeline_mode<synchronous>, transform_indices = @transform_9, window_bounds = array<i64: 1, 128>}, {pipeline_mode = #tpu.pipeline_mode<synchronous>, transform_indices = @transform_10, window_bounds = array<i64: 256, 128>}, {pipeline_mode = #tpu.pipeline_mode<synchronous>, transform_indices = @transform_11, window_bounds = array<i64: 1, 128>}, {transform_indices = @transform_12, window_bounds = array<i64: 16, 128>}]} {
    %c0_i32 = arith.constant 0 : i32
    %0 = arith.cmpi eq, %arg1, %c0_i32 : i32
    %1 = arith.extui %0 : i1 to i32
    %c0_i32_0 = arith.constant 0 : i32
    %2 = arith.cmpi ne, %1, %c0_i32_0 : i32
    scf.if %2 {
      %cst = arith.constant 0.000000e+00 : f32
      %12 = vector.broadcast %cst : f32 to vector<16x256xf32>
      %c0 = arith.constant 0 : index
      %c0_6 = arith.constant 0 : index
      %13 = vector.load %arg15[%c0, %c0_6] : memref<16x256xf32, #tpu.memory_space<vmem>>, vector<16x256xf32>
      tpu.vector_store %arg15[%c0, %c0_6], %12 {strides = array<i32>} : memref<16x256xf32, #tpu.memory_space<vmem>>, vector<16x256xf32>,
      %cst_7 = arith.constant 0.000000e+00 : f32
      %14 = vector.broadcast %cst_7 : f32 to vector<16x256xf32>
      %c0_8 = arith.constant 0 : index
      %c0_9 = arith.constant 0 : index
      %15 = vector.load %arg16[%c0_8, %c0_9] : memref<16x256xf32, #tpu.memory_space<vmem>>, vector<16x256xf32>
      tpu.vector_store %arg16[%c0_8, %c0_9], %14 {strides = array<i32>} : memref<16x256xf32, #tpu.memory_space<vmem>>, vector<16x256xf32>,
    } else {
    }
    %c1_i32 = arith.constant 1 : i32
    %3 = arith.cmpi slt, %arg1, %c1_i32 : i32
    %4 = arith.extui %3 : i1 to i32
    %c0_i32_1 = arith.constant 0 : i32
    %5 = arith.cmpi ne, %4, %c0_i32_1 : i32
    scf.if %5 {
      %c0 = arith.constant 0 : index
      %c0_6 = arith.constant 0 : index
      %12 = vector.load %arg15[%c0, %c0_6] : memref<16x256xf32, #tpu.memory_space<vmem>>, vector<16x256xf32>
      %c0_7 = arith.constant 0 : index
      %c0_8 = arith.constant 0 : index
      %13 = vector.load %arg2[%c0_7, %c0_8] : memref<16x512xbf16, #tpu.memory_space<vmem>>, vector<16x512xbf16>
      %c0_9 = arith.constant 0 : index
      %c0_10 = arith.constant 0 : index
      %14 = vector.load %arg4[%c0_9, %c0_10] : memref<512x256xbf16, #tpu.memory_space<vmem>>, vector<512x256xbf16>
      %cst = arith.constant dense<0.000000e+00> : vector<16x256xf32>
      %15 = tpu.matmul %13, %14, %cst {dimension_numbers = #tpu.dot_dimension_numbers<[1], [0], [0], [1], [0, 0, 1, 1], [], []>} : vector<16x512xbf16>, vector<512x256xbf16>, vector<16x256xf32> -> vector<16x256xf32>
      %16 = arith.addf %12, %15 : vector<16x256xf32>
      %c0_11 = arith.constant 0 : index
      %c0_12 = arith.constant 0 : index
      %17 = vector.load %arg15[%c0_11, %c0_12] : memref<16x256xf32, #tpu.memory_space<vmem>>, vector<16x256xf32>
      tpu.vector_store %arg15[%c0_11, %c0_12], %16 {strides = array<i32>} : memref<16x256xf32, #tpu.memory_space<vmem>>, vector<16x256xf32>,
    } else {
    }
    %c1_i32_2 = arith.constant 1 : i32
    %6 = arith.cmpi slt, %arg1, %c1_i32_2 : i32
    %7 = arith.extui %6 : i1 to i32
    %c0_i32_3 = arith.constant 0 : i32
    %8 = arith.cmpi ne, %7, %c0_i32_3 : i32
    scf.if %8 {
      %c0 = arith.constant 0 : index
      %c0_6 = arith.constant 0 : index
      %c0_7 = arith.constant 0 : index
      %12 = vector.load %arg3[%c0, %c0_6, %c0_7] : memref<16x16x128xbf16, #tpu.memory_space<vmem>>, vector<16x16x128xbf16>
      %13 = arith.extf %12 : vector<16x16x128xbf16> to vector<16x16x128xf32>
      %cst = arith.constant dense<0.000000e+00> : vector<16x128xf32>
      %14 = vector.multi_reduction <add>, %13, %cst [1] : vector<16x16x128xf32> to vector<16x128xf32>
      %c0_8 = arith.constant 0 : index
      %c0_9 = arith.constant 0 : index
      %15 = vector.load %arg16[%c0_8, %c0_9] : memref<16x256xf32, #tpu.memory_space<vmem>>, vector<16x256xf32>
      %16 = arith.truncf %14 : vector<16x128xf32> to vector<16x128xbf16>
      %c0_10 = arith.constant 0 : index
      %c0_11 = arith.constant 0 : index
      %17 = vector.load %arg8[%c0_10, %c0_11] : memref<128x256xbf16, #tpu.memory_space<vmem>>, vector<128x256xbf16>
      %cst_12 = arith.constant dense<0.000000e+00> : vector<16x256xf32>
      %18 = tpu.matmul %16, %17, %cst_12 {dimension_numbers = #tpu.dot_dimension_numbers<[1], [0], [0], [1], [0, 0, 1, 1], [], []>} : vector<16x128xbf16>, vector<128x256xbf16>, vector<16x256xf32> -> vector<16x256xf32>
      %19 = arith.addf %15, %18 : vector<16x256xf32>
      %c0_13 = arith.constant 0 : index
      %c0_14 = arith.constant 0 : index
      %20 = vector.load %arg16[%c0_13, %c0_14] : memref<16x256xf32, #tpu.memory_space<vmem>>, vector<16x256xf32>
      tpu.vector_store %arg16[%c0_13, %c0_14], %19 {strides = array<i32>} : memref<16x256xf32, #tpu.memory_space<vmem>>, vector<16x256xf32>,
    } else {
    }
    %c0_i32_4 = arith.constant 0 : i32
    %9 = arith.cmpi eq, %arg1, %c0_i32_4 : i32
    %10 = arith.extui %9 : i1 to i32
    %c0_i32_5 = arith.constant 0 : i32
    %11 = arith.cmpi ne, %10, %c0_i32_5 : i32
    scf.if %11 {
      %c0 = arith.constant 0 : index
      %c0_6 = arith.constant 0 : index
      %12 = vector.load %arg15[%c0, %c0_6] : memref<16x256xf32, #tpu.memory_space<vmem>>, vector<16x256xf32>
      %c0_7 = arith.constant 0 : index
      %c0_8 = arith.constant 0 : index
      %13 = vector.load %arg5[%c0_7, %c0_8] : memref<1x256xf32, #tpu.memory_space<vmem>>, vector<1x256xf32>
      %14 = vector.broadcast %13 : vector<1x256xf32> to vector<16x256xf32>
      %15 = arith.addf %12, %14 : vector<16x256xf32>
      %cst = arith.constant 0.000000e+00 : f32
      %16 = vector.broadcast %cst : f32 to vector<16x256xf32>
      %17 = arith.maximumf %15, %16 : vector<16x256xf32>
      %18 = arith.truncf %17 : vector<16x256xf32> to vector<16x256xbf16>
      %c0_9 = arith.constant 0 : index
      %c0_10 = arith.constant 0 : index
      %19 = vector.load %arg6[%c0_9, %c0_10] : memref<256x128xbf16, #tpu.memory_space<vmem>>, vector<256x128xbf16>
      %cst_11 = arith.constant dense<0.000000e+00> : vector<16x128xf32>
      %20 = tpu.matmul %18, %19, %cst_11 {dimension_numbers = #tpu.dot_dimension_numbers<[1], [0], [0], [1], [0, 0, 1, 1], [], []>} : vector<16x256xbf16>, vector<256x128xbf16>, vector<16x128xf32> -> vector<16x128xf32>
      %c0_12 = arith.constant 0 : index
      %c0_13 = arith.constant 0 : index
      %21 = vector.load %arg7[%c0_12, %c0_13] : memref<1x128xf32, #tpu.memory_space<vmem>>, vector<1x128xf32>
      %22 = vector.broadcast %21 : vector<1x128xf32> to vector<16x128xf32>
      %23 = arith.addf %20, %22 : vector<16x128xf32>
      %cst_14 = arith.constant 0.000000e+00 : f32
      %24 = vector.broadcast %cst_14 : f32 to vector<16x128xf32>
      %25 = arith.maximumf %23, %24 : vector<16x128xf32>
      %c0_15 = arith.constant 0 : index
      %c0_16 = arith.constant 0 : index
      %26 = vector.load %arg16[%c0_15, %c0_16] : memref<16x256xf32, #tpu.memory_space<vmem>>, vector<16x256xf32>
      %c0_17 = arith.constant 0 : index
      %c0_18 = arith.constant 0 : index
      %27 = vector.load %arg9[%c0_17, %c0_18] : memref<1x256xf32, #tpu.memory_space<vmem>>, vector<1x256xf32>
      %28 = vector.broadcast %27 : vector<1x256xf32> to vector<16x256xf32>
      %29 = arith.addf %26, %28 : vector<16x256xf32>
      %cst_19 = arith.constant 0.000000e+00 : f32
      %30 = vector.broadcast %cst_19 : f32 to vector<16x256xf32>
      %31 = arith.maximumf %29, %30 : vector<16x256xf32>
      %32 = arith.truncf %31 : vector<16x256xf32> to vector<16x256xbf16>
      %c0_20 = arith.constant 0 : index
      %c0_21 = arith.constant 0 : index
      %33 = vector.load %arg10[%c0_20, %c0_21] : memref<256x128xbf16, #tpu.memory_space<vmem>>, vector<256x128xbf16>
      %cst_22 = arith.constant dense<0.000000e+00> : vector<16x128xf32>
      %34 = tpu.matmul %32, %33, %cst_22 {dimension_numbers = #tpu.dot_dimension_numbers<[1], [0], [0], [1], [0, 0, 1, 1], [], []>} : vector<16x256xbf16>, vector<256x128xbf16>, vector<16x128xf32> -> vector<16x128xf32>
      %c0_23 = arith.constant 0 : index
      %c0_24 = arith.constant 0 : index
      %35 = vector.load %arg11[%c0_23, %c0_24] : memref<1x128xf32, #tpu.memory_space<vmem>>, vector<1x128xf32>
      %36 = vector.broadcast %35 : vector<1x128xf32> to vector<16x128xf32>
      %37 = arith.addf %34, %36 : vector<16x128xf32>
      %cst_25 = arith.constant 0.000000e+00 : f32
      %38 = vector.broadcast %cst_25 : f32 to vector<16x128xf32>
      %39 = arith.maximumf %37, %38 : vector<16x128xf32>
      %40 = arith.truncf %25 : vector<16x128xf32> to vector<16x128xbf16>
      %41 = arith.truncf %39 : vector<16x128xf32> to vector<16x128xbf16>
      %42 = tpu.concatenate %40, %41 in 1 : vector<16x128xbf16>, vector<16x128xbf16> -> vector<16x256xbf16>
      %c0_26 = arith.constant 0 : index
      %c0_27 = arith.constant 0 : index
      %43 = vector.load %arg12[%c0_26, %c0_27] : memref<256x128xbf16, #tpu.memory_space<vmem>>, vector<256x128xbf16>
      %cst_28 = arith.constant dense<0.000000e+00> : vector<16x128xf32>
      %44 = tpu.matmul %42, %43, %cst_28 {dimension_numbers = #tpu.dot_dimension_numbers<[1], [0], [0], [1], [0, 0, 1, 1], [], []>} : vector<16x256xbf16>, vector<256x128xbf16>, vector<16x128xf32> -> vector<16x128xf32>
      %c0_29 = arith.constant 0 : index
      %c0_30 = arith.constant 0 : index
      %45 = vector.load %arg13[%c0_29, %c0_30] : memref<1x128xf32, #tpu.memory_space<vmem>>, vector<1x128xf32>
      %46 = vector.broadcast %45 : vector<1x128xf32> to vector<16x128xf32>
      %47 = arith.addf %44, %46 : vector<16x128xf32>
      %c0_31 = arith.constant 0 : index
      %c0_32 = arith.constant 0 : index
      %48 = vector.load %arg14[%c0_31, %c0_32] : memref<16x128xf32, #tpu.memory_space<vmem>>, vector<16x128xf32>
      tpu.vector_store %arg14[%c0_31, %c0_32], %47 {strides = array<i32>} : memref<16x128xf32, #tpu.memory_space<vmem>>, vector<16x128xf32>,
    } else {
    }
    return
  }
  func.func @transform_0(%arg0: i32, %arg1: i32) -> (i32, i32) {
    %c0_i32 = arith.constant 0 : i32
    return %arg0, %arg1 : i32, i32
  }
  func.func @transform_1(%arg0: i32, %arg1: i32) -> (i32, i32, i32) {
    %c0_i32 = arith.constant 0 : i32
    %c0_i32_0 = arith.constant 0 : i32
    return %arg0, %arg1, %c0_i32 : i32, i32, i32
  }
  func.func @transform_2(%arg0: i32, %arg1: i32) -> (i32, i32) {
    %c0_i32 = arith.constant 0 : i32
    %c0_i32_0 = arith.constant 0 : i32
    return %arg1, %c0_i32 : i32, i32
  }
  func.func @transform_3(%arg0: i32, %arg1: i32) -> (i32, i32) {
    %c0_i32 = arith.constant 0 : i32
    %c0_i32_0 = arith.constant 0 : i32
    %c0_i32_1 = arith.constant 0 : i32
    return %c0_i32, %c0_i32_0 : i32, i32
  }
  func.func @transform_4(%arg0: i32, %arg1: i32) -> (i32, i32) {
    %c0_i32 = arith.constant 0 : i32
    %c0_i32_0 = arith.constant 0 : i32
    %c0_i32_1 = arith.constant 0 : i32
    return %c0_i32, %c0_i32_0 : i32, i32
  }
  func.func @transform_5(%arg0: i32, %arg1: i32) -> (i32, i32) {
    %c0_i32 = arith.constant 0 : i32
    %c0_i32_0 = arith.constant 0 : i32
    %c0_i32_1 = arith.constant 0 : i32
    return %c0_i32, %c0_i32_0 : i32, i32
  }
  func.func @transform_6(%arg0: i32, %arg1: i32) -> (i32, i32) {
    %c0_i32 = arith.constant 0 : i32
    %c0_i32_0 = arith.constant 0 : i32
    %c0_i32_1 = arith.constant 0 : i32
    return %c0_i32, %c0_i32_0 : i32, i32
  }
  func.func @transform_7(%arg0: i32, %arg1: i32) -> (i32, i32) {
    %c0_i32 = arith.constant 0 : i32
    %c0_i32_0 = arith.constant 0 : i32
    %c0_i32_1 = arith.constant 0 : i32
    return %c0_i32, %c0_i32_0 : i32, i32
  }
  func.func @transform_8(%arg0: i32, %arg1: i32) -> (i32, i32) {
    %c0_i32 = arith.constant 0 : i32
    %c0_i32_0 = arith.constant 0 : i32
    %c0_i32_1 = arith.constant 0 : i32
    return %c0_i32, %c0_i32_0 : i32, i32
  }
  func.func @transform_9(%arg0: i32, %arg1: i32) -> (i32, i32) {
    %c0_i32 = arith.constant 0 : i32
    %c0_i32_0 = arith.constant 0 : i32
    %c0_i32_1 = arith.constant 0 : i32
    return %c0_i32, %c0_i32_0 : i32, i32
  }
  func.func @transform_10(%arg0: i32, %arg1: i32) -> (i32, i32) {
    %c0_i32 = arith.constant 0 : i32
    %c0_i32_0 = arith.constant 0 : i32
    %c0_i32_1 = arith.constant 0 : i32
    return %c0_i32, %c0_i32_0 : i32, i32
  }
  func.func @transform_11(%arg0: i32, %arg1: i32) -> (i32, i32) {
    %c0_i32 = arith.constant 0 : i32
    %c0_i32_0 = arith.constant 0 : i32
    %c0_i32_1 = arith.constant 0 : i32
    return %c0_i32, %c0_i32_0 : i32, i32
  }
  func.func @transform_12(%arg0: i32, %arg1: i32) -> (i32, i32) {
    %c0_i32 = arith.constant 0 : i32
    %c0_i32_0 = arith.constant 0 : i32
    return %arg0, %c0_i32 : i32, i32
  }
}

</mosaic_0001>

<bundles_post_ra>
// kernel: tpu_custom_call.1
= control target key start
LH: loop header
LB: loop body
LE: loop exit
PB: predicated region body
PF: predicated region fallthrough
CT: control target
= control target key end

     0   :  { %17 = vsyncpa [#allocation5], 0  ;;  %s3129_s0 = inlined_call_operand.hbm [shape: bf16[16,512], index: 0, kind: input, shape index: {}]   ;;  %s3130_s1 = inlined_call_operand.hbm [shape: bf16[16,16,128], index: 1, kind: input, shape index: {}]   ;;  %s3131_s2 = inlined_call_operand.hbm [shape: bf16[512,256], index: 2, kind: input, shape index: {}]   ;;  %s3132_s3 = inlined_call_operand.vmem [shape: f32[1,256], index: 3, kind: input, shape index: {}]   ;;  %s3133_s4 = inlined_call_operand.hbm [shape: bf16[256,128], index: 4, kind: input, shape index: {}]   ;;  %s3134_s5 = inlined_call_operand.hbm [shape: f32[1,128], index: 5, kind: input, shape index: {}]   ;;  %s3135_s6 = inlined_call_operand.hbm [shape: bf16[128,256], index: 6, kind: input, shape index: {}]   ;;  %s3136_s7 = inlined_call_operand.vmem [shape: f32[1,256], index: 7, kind: input, shape index: {}]   ;;  %s3137_s8 = inlined_call_operand.hbm [shape: bf16[256,128], index: 8, kind: input, shape index: {}]   ;;  %s3138_s9 = inlined_call_operand.vmem [shape: f32[1,128], index: 9, kind: input, shape index: {}]   ;;  %s3139_s10 = inlined_call_operand.hbm [shape: bf16[256,128], index: 10, kind: input, shape index: {}]   ;;  %s3140_s11 = inlined_call_operand.vmem [shape: f32[1,128], index: 11, kind: input, shape index: {}]   ;;  %s3141_s12 = inlined_call_operand.hbm [shape: f32[16,128], index: 12, kind: output, shape index: {}]  }
   0x1   :  { %18 = vsyncpa [#allocation8], 0 }
   0x2   :  { %19 = vsyncpa [#allocation11], 0 }
   0x3   :  { %20 = vsyncpa [#allocation14], 0 }
   0x4   :  { %21 = vsyncpa [#allocation17], 0  ;;  %s40_s23 = sshll.u32 %s3130_s1, 4  ;;  %s41_s23 = int_to_ptr.hbm [resolvable:$true] %s40_s23 }
   0x5   :  { %22 = vsyncpa [#allocation6], 0  ;;  %s2649_s24 = smov [#allocation7]   ;;  %s68_s28 = sshll.u32 %s3133_s4, 4  ;;  %s69_s28 = int_to_ptr.hbm [resolvable:$true] %s68_s28 }
   0x6   :  { %s42_s25 = sshll.u32 %s2649_s24, 4  ;;  %s2650_s29 = smov 64   ;;  %s43_s25 = int_to_ptr.vmem [resolvable:$true] %s42_s25 }
   0x7   :  { %s2651_s30 = smov 4   ;;  %s2652_s13 = smov [#allocation10]  }
   0x8   :  { %48 = dma.hbm_to_vmem [thread:$0]  %s41_s23, 2048, %s43_s25, [#allocation8], %s2650_s29, %s2650_s29, %s2651_s30  }
   0x9   :  { %s70_s14 = sshll.u32 %s2652_s13, 4  ;;  %s92_s16 = sshll.u32 %s3135_s6, 4  ;;  %s71_s14 = int_to_ptr.vmem [resolvable:$true] %s70_s14  ;;  %s93_s16 = int_to_ptr.hbm [resolvable:$true] %s92_s16 }
   0xa   :  { %76 = dma.hbm_to_vmem [thread:$0]  %s69_s28, 2048, %s71_s14, [#allocation11], %s2650_s29, %s2650_s29, %s2651_s30  }
   0xb   :  { %s2653_s4 = smov [#allocation13]   ;;  %s27_s20 = sshll.u32 %s3129_s0, 4  ;;  %s28_s20 = int_to_ptr.hbm [resolvable:$true] %s27_s20 }
   0xc   :  { %s94_s17 = sshll.u32 %s2653_s4, 4  ;;  %s2654_s21 = smov 128   ;;  %s95_s17 = int_to_ptr.vmem [resolvable:$true] %s94_s17 }
   0xd   :  { %s2655_s22 = smov 8   ;;  %s2656_s23 = smov [#allocation4]  }
   0xe   :  { %100 = dma.hbm_to_vmem [thread:$0]  %s93_s16, 2048, %s95_s17, [#allocation14], %s2654_s21, %s2654_s21, %s2655_s22  }
   0xf   :  { %s29_s24 = sshll.u32 %s2656_s23, 4  ;;  %s2657_s25 = smov 256   ;;  %s30_s24 = int_to_ptr.vmem [resolvable:$true] %s29_s24 }
  0x10   :  { %s2658_s6 = smov 16   ;;  %s53_s28 = sshll.u32 %s3131_s2, 4  ;;  %s54_s28 = int_to_ptr.hbm [resolvable:$true] %s53_s28 }
  0x11   :  { %35 = dma.hbm_to_vmem [thread:$0]  %s28_s20, 512, %s30_s24, [#allocation5], %s2657_s25, %s2657_s25, %s2658_s6  }
  0x12   :  { %s2659_s13 = smov [#allocation9]   ;;  %s82_s15 = sshll.u32 %s3134_s5, 4  ;;  %s83_s15 = int_to_ptr.hbm [resolvable:$true] %s82_s15 }
  0x13   :  { %s55_s0 = sshll.u32 %s2659_s13, 4  ;;  %s2660_s16 = smov [#allocation12]   ;;  %s56_s0 = int_to_ptr.vmem [resolvable:$true] %s55_s0 }
  0x14   :  { %61 = dma.hbm_to_vmem [thread:$0]  %s54_s28, 8192, %s56_s0, [#allocation8], %s2654_s21, %s2654_s21, %s2655_s22  }
  0x15   :  { %s84_s4 = sshll.u32 %s2660_s16, 4  ;;  %s107_s19 = sshll.u32 %s3137_s8, 4  ;;  %s85_s4 = int_to_ptr.vmem [resolvable:$true] %s84_s4  ;;  %s108_s19 = int_to_ptr.hbm [resolvable:$true] %s107_s19 }
  0x16   :  { %87 = dma.hbm_to_vmem [thread:$0]  %s83_s15, 16, %s85_s4, [#allocation11]  }
  0x17   :  { %s122_s23 = sshll.u32 %s3139_s10, 4  ;;  %s2661_s24 = smov [#allocation15]   ;;  %s123_s23 = int_to_ptr.hbm [resolvable:$true] %s122_s23 }
  0x18   :  { %s109_s5 = sshll.u32 %s2661_s24, 4  ;;  %s2662_s25 = smov [#allocation16]   ;;  %s110_s5 = int_to_ptr.vmem [resolvable:$true] %s109_s5 }
  0x19   :  { %115 = dma.hbm_to_vmem [thread:$0]  %s108_s19, 2048, %s110_s5, [#allocation14], %s2650_s29, %s2650_s29, %s2651_s30  }
  0x1a   :  { %s124_s6 = sshll.u32 %s2662_s25, 4  ;;  %s125_s6 = int_to_ptr.vmem [resolvable:$true] %s124_s6 }
  0x1b   :  { %130 = dma.hbm_to_vmem [thread:$0]  %s123_s23, 2048, %s125_s6, [#allocation17], %s2650_s29, %s2650_s29, %s2651_s30  }
  0x1c   :  { %2637 = dma.done.wait [#allocation5], 512  }
  0x1d   :  { %2638 = vsyncadd [#allocation5], 4294966784 }
  0x1e   :  { %2639 = dma.done.wait [#allocation8], 10240  }
  0x1f   :  { %2640 = vsyncadd [#allocation8], 4294957056 }
  0x20   :  { %2641 = dma.done.wait [#allocation11], 2064  }
  0x21   :  { %2642 = vsyncadd [#allocation11], 4294965232 }
  0x22   :  { %2643 = dma.done.wait [#allocation14], 4096  }
  0x23   :  { %2644 = vsyncadd [#allocation14], 4294963200 }
  0x24   :  { %2645 = dma.done.wait [#allocation17], 2048  }
  0x25   :  { %2646 = vsyncadd [#allocation17], 4294965248  ;;  %v1738_v0 = vld [vmem:[#allocation9 + $0x70] sm:$0xf]  ;;  %v2211_v1 = vld [vmem:[#allocation9 + $0x74] sm:$0xf0] }
  0x26   :  { %v1802_v2 = vld [vmem:[#allocation9 + $0xf0] sm:$0xf]  ;;  %v1739_v3 = vor.u32 %v2211_v1, %v1738_v0  ;;  %v2227_v4 = vld [vmem:[#allocation9 + $0xf4] sm:$0xf0]  ;;  %v1730_v11 = vld [vmem:[#allocation9 + $0x60] sm:$0xf] }
  0x27   :  { %v1866_v5 = vld [vmem:[#allocation9 + $0x170] sm:$0xf]  ;;  %v2243_v6 = vld [vmem:[#allocation9 + $0x174] sm:$0xf0]  ;;  %v1803_v7 = vor.u32 %v2227_v4, %v1802_v2  ;;  %v2209_v13 = vld [vmem:[#allocation9 + $0x64] sm:$0xf0] }
  0x28   :  { %v1867_v8 = vor.u32 %v2243_v6, %v1866_v5  ;;  %v1930_v9 = vld [vmem:[#allocation9 + $0x1f0] sm:$0xf]  ;;  %v2259_v10 = vld [vmem:[#allocation9 + $0x1f4] sm:$0xf0]  ;;  %593 = vmatpush.bf16.msra.mxu0 %v1739_v3  ;;  %v1794_v14 = vld [vmem:[#allocation9 + $0xe0] sm:$0xf]  ;;  %v1731_v16 = vor.u32 %v2209_v13, %v1730_v11 }
  0x29   :  { %v1931_v12 = vor.u32 %v2259_v10, %v1930_v9  ;;  %v2225_v15 = vld [vmem:[#allocation9 + $0xe4] sm:$0xf0]  ;;  %607 = vmatpush.bf16.msra.mxu1 %v1803_v7  ;;  %v1858_v18 = vld [vmem:[#allocation9 + $0x160] sm:$0xf]  ;;  %v1722_v23 = vld [vmem:[#allocation9 + $0x50] sm:$0xf] }
  0x2a   :  { %621 = vmatpush.bf16.msra.mxu2 %v1867_v8  ;;  %v1795_v17 = vor.u32 %v2225_v15, %v1794_v14  ;;  %v2241_v19 = vld [vmem:[#allocation9 + $0x164] sm:$0xf0]  ;;  %v1922_v20 = vld [vmem:[#allocation9 + $0x1e0] sm:$0xf]  ;;  %v2207_v24 = vld [vmem:[#allocation9 + $0x54] sm:$0xf0] }
  0x2b   :  { %635 = vmatpush.bf16.msra.mxu3 %v1931_v12  ;;  %v1859_v21 = vor.u32 %v2241_v19, %v1858_v18  ;;  %v2257_v22 = vld [vmem:[#allocation9 + $0x1e4] sm:$0xf0]  ;;  %v1786_v26 = vld [vmem:[#allocation9 + $0xd0] sm:$0xf]  ;;  %v2223_v27 = vld [vmem:[#allocation9 + $0xd4] sm:$0xf0]  ;;  %v1723_v29 = vor.u32 %v2207_v24, %v1722_v23 }
  0x2c   :  { %v1923_v25 = vor.u32 %v2257_v22, %v1922_v20  ;;  %v1850_v28 = vld [vmem:[#allocation9 + $0x150] sm:$0xf]  ;;  %594 = vmatpush.bf16.msra.mxu0 %v1731_v16  ;;  %v2239_v30 = vld [vmem:[#allocation9 + $0x154] sm:$0xf0]  ;;  %v1787_v33 = vor.u32 %v2223_v27, %v1786_v26  ;;  %v1714_v35 = vld [vmem:[#allocation9 + $0x40] sm:$0xf] }
  0x2d   :  { %v1914_v31 = vld [vmem:[#allocation9 + $0x1d0] sm:$0xf]  ;;  %v2255_v32 = vld [vmem:[#allocation9 + $0x1d4] sm:$0xf0]  ;;  %608 = vmatpush.bf16.msra.mxu1 %v1795_v17  ;;  %v1851_v34 = vor.u32 %v2239_v30, %v1850_v28  ;;  %v2205_v36 = vld [vmem:[#allocation9 + $0x44] sm:$0xf0] }
  0x2e   :  { %622 = vmatpush.bf16.msra.mxu2 %v1859_v21  ;;  %v1778_v37 = vld [vmem:[#allocation9 + $0xc0] sm:$0xf]  ;;  %v1915_v38 = vor.u32 %v2255_v32, %v1914_v31  ;;  %v2221_v39 = vld [vmem:[#allocation9 + $0xc4] sm:$0xf0]  ;;  %v1715_v44 = vor.u32 %v2205_v36, %v1714_v35  ;;  %v1706_v47 = vld [vmem:[#allocation9 + $0x30] sm:$0xf] }
  0x2f   :  { %636 = vmatpush.bf16.msra.mxu3 %v1923_v25  ;;  %v1842_v40 = vld [vmem:[#allocation9 + $0x140] sm:$0xf]  ;;  %v2237_v41 = vld [vmem:[#allocation9 + $0x144] sm:$0xf0]  ;;  %v1779_v45 = vor.u32 %v2221_v39, %v1778_v37  ;;  %v2203_v48 = vld [vmem:[#allocation9 + $0x34] sm:$0xf0] }
  0x30   :  { %v1906_v42 = vld [vmem:[#allocation9 + $0x1c0] sm:$0xf]  ;;  %v2253_v43 = vld [vmem:[#allocation9 + $0x1c4] sm:$0xf0]  ;;  %595 = vmatpush.bf16.msra.mxu0 %v1723_v29  ;;  %v1843_v46 = vor.u32 %v2237_v41, %v1842_v40  ;;  %v1770_v49 = vld [vmem:[#allocation9 + $0xb0] sm:$0xf]  ;;  %v1707_v56 = vor.u32 %v2203_v48, %v1706_v47 }
  0x31   :  { %609 = vmatpush.bf16.msra.mxu1 %v1787_v33  ;;  %v1907_v50 = vor.u32 %v2253_v43, %v1906_v42  ;;  %v2219_v51 = vld [vmem:[#allocation9 + $0xb4] sm:$0xf0]  ;;  %v1834_v52 = vld [vmem:[#allocation9 + $0x130] sm:$0xf]  ;;  %v1698_v59 = vld [vmem:[#allocation9 + $0x20] sm:$0xf] }
  0x32   :  { %623 = vmatpush.bf16.msra.mxu2 %v1851_v34  ;;  %v2235_v53 = vld [vmem:[#allocation9 + $0x134] sm:$0xf0]  ;;  %v1898_v54 = vld [vmem:[#allocation9 + $0x1b0] sm:$0xf]  ;;  %v1771_v57 = vor.u32 %v2219_v51, %v1770_v49  ;;  %v2201_v60 = vld [vmem:[#allocation9 + $0x24] sm:$0xf0] }
  0x33   :  { %637 = vmatpush.bf16.msra.mxu3 %v1915_v38  ;;  %v2251_v55 = vld [vmem:[#allocation9 + $0x1b4] sm:$0xf0]  ;;  %v1835_v58 = vor.u32 %v2235_v53, %v1834_v52  ;;  %v1762_v61 = vld [vmem:[#allocation9 + $0xa0] sm:$0xf]  ;;  %v2217_v63 = vld [vmem:[#allocation9 + $0xa4] sm:$0xf0]  ;;  %v1699_v4 = vor.u32 %v2201_v60, %v1698_v59 }
  0x34   :  { %596 = vmatpush.bf16.msra.mxu0 %v1715_v44  ;;  %v1899_v62 = vor.u32 %v2251_v55, %v1898_v54  ;;  %v1826_v0 = vld [vmem:[#allocation9 + $0x120] sm:$0xf]  ;;  %v2233_v1 = vld [vmem:[#allocation9 + $0x124] sm:$0xf0]  ;;  %v1763_v5 = vor.u32 %v2217_v63, %v1762_v61  ;;  %v1690_v7 = vld [vmem:[#allocation9 + $0x10] sm:$0xf] }
  0x35   :  { %610 = vmatpush.bf16.msra.mxu1 %v1779_v45  ;;  %v1890_v2 = vld [vmem:[#allocation9 + $0x1a0] sm:$0xf]  ;;  %v2249_v3 = vld [vmem:[#allocation9 + $0x1a4] sm:$0xf0]  ;;  %v1827_v6 = vor.u32 %v2233_v1, %v1826_v0  ;;  %v2199_v8 = vld [vmem:[#allocation9 + $0x14] sm:$0xf0] }
  0x36   :  { %624 = vmatpush.bf16.msra.mxu2 %v1843_v46  ;;  %v1754_v9 = vld [vmem:[#allocation9 + $0x90] sm:$0xf]  ;;  %v1891_v10 = vor.u32 %v2249_v3, %v1890_v2  ;;  %v2215_v11 = vld [vmem:[#allocation9 + $0x94] sm:$0xf0]  ;;  %v1682_v16 = vld [vmem:[#allocation9] sm:$0xf]  ;;  %v1691_v17 = vor.u32 %v2199_v8, %v1690_v7 }
  0x37   :  { %638 = vmatpush.bf16.msra.mxu3 %v1907_v50  ;;  %v1818_v12 = vld [vmem:[#allocation9 + $0x110] sm:$0xf]  ;;  %v2231_v13 = vld [vmem:[#allocation9 + $0x114] sm:$0xf0]  ;;  %v2197_v18 = vld [vmem:[#allocation9 + $0x4] sm:$0xf0]  ;;  %v1755_v21 = vor.u32 %v2215_v11, %v1754_v9 }
  0x38   :  { %597 = vmatpush.bf16.msra.mxu0 %v1707_v56  ;;  %v1882_v14 = vld [vmem:[#allocation9 + $0x190] sm:$0xf]  ;;  %v2247_v15 = vld [vmem:[#allocation9 + $0x194] sm:$0xf0]  ;;  %v1746_v19 = vld [vmem:[#allocation9 + $0x80] sm:$0xf]  ;;  %v1819_v22 = vor.u32 %v2231_v13, %v1818_v12  ;;  %v1683_v33 = vor.u32 %v2197_v18, %v1682_v16 }
  0x39   :  { %611 = vmatpush.bf16.msra.mxu1 %v1771_v57  ;;  %v2213_v20 = vld [vmem:[#allocation9 + $0x84] sm:$0xf0]  ;;  %v1810_v23 = vld [vmem:[#allocation9 + $0x100] sm:$0xf]  ;;  %v2210_v25 = vld [vmem:[#allocation9 + $0x74] sm:$0xf]  ;;  %v1883_v26 = vor.u32 %v2247_v15, %v1882_v14 }
  0x3a   :  { %625 = vmatpush.bf16.msra.mxu2 %v1835_v58  ;;  %v2229_v24 = vld [vmem:[#allocation9 + $0x104] sm:$0xf0]  ;;  %v1740_v27 = vld [vmem:[#allocation9 + $0x78] sm:$0xf0]  ;;  %v2226_v28 = vld [vmem:[#allocation9 + $0xf4] sm:$0xf]  ;;  %v1747_v37 = vor.u32 %v2213_v20, %v1746_v19 }
  0x3b   :  { %639 = vmatpush.bf16.msra.mxu3 %v1899_v62  ;;  %v1804_v29 = vld [vmem:[#allocation9 + $0xf8] sm:$0xf0]  ;;  %v2242_v30 = vld [vmem:[#allocation9 + $0x174] sm:$0xf]  ;;  %v1874_v32 = vld [vmem:[#allocation9 + $0x180] sm:$0xf]  ;;  %v1811_v38 = vor.u32 %v2229_v24, %v1810_v23  ;;  %v1743_v44 = vor.u32 %v2210_v25, %v1740_v27 }
  0x3c   :  { %598 = vmatpush.bf16.msra.mxu0 %v1699_v4  ;;  %v1868_v31 = vld [vmem:[#allocation9 + $0x178] sm:$0xf0]  ;;  %v2245_v34 = vld [vmem:[#allocation9 + $0x184] sm:$0xf0]  ;;  %v2258_v35 = vld [vmem:[#allocation9 + $0x1f4] sm:$0xf]  ;;  %v1807_v45 = vor.u32 %v2226_v28, %v1804_v29 }
  0x3d   :  { %612 = vmatpush.bf16.msra.mxu1 %v1763_v5  ;;  %v1932_v36 = vld [vmem:[#allocation9 + $0x1f8] sm:$0xf0]  ;;  %v2208_v39 = vld [vmem:[#allocation9 + $0x64] sm:$0xf]  ;;  %v1732_v40 = vld [vmem:[#allocation9 + $0x68] sm:$0xf0]  ;;  %v1871_v49 = vor.u32 %v2242_v30, %v1868_v31  ;;  %v1875_v50 = vor.u32 %v2245_v34, %v1874_v32 }
  0x3e   :  { %626 = vmatpush.bf16.msra.mxu2 %v1827_v6  ;;  %v2224_v41 = vld [vmem:[#allocation9 + $0xe4] sm:$0xf]  ;;  %v1674_v42 = vld [vmem:[#allocation4 + $0x8] sm:$0xf]  ;;  %v2195_v43 = vld [vmem:[#allocation4 + $0x14] sm:$0xf0]  ;;  %v1935_v54 = vor.u32 %v2258_v35, %v1932_v36  ;;  %v1735_v63 = vor.u32 %v2208_v39, %v1732_v40 }
  0x3f   :  { %640 = vmatpush.bf16.msra.mxu3 %v1891_v10  ;;  %v1796_v46 = vld [vmem:[#allocation9 + $0xe8] sm:$0xf0]  ;;  %v2240_v47 = vld [vmem:[#allocation9 + $0x164] sm:$0xf]  ;;  %v1676_v52 = vld [vmem:[#allocation4 + $0x18] sm:$0xf0]  ;;  %v2771_v55 = vor.u32 %v2195_v43, %v1674_v42 }
  0x40   :  { %599 = vmatpush.bf16.msra.mxu0 %v1691_v17  ;;  %v1860_v48 = vld [vmem:[#allocation9 + $0x168] sm:$0xf0]  ;;  %v1666_v53 = vld [vmem:[#allocation4] sm:$0xf]  ;;  %v2194_v56 = vld [vmem:[#allocation4 + $0xc] sm:$0xf0]  ;;  %v1799_v0 = vor.u32 %v2224_v41, %v1796_v46 }
  0x41   :  { %613 = vmatpush.bf16.msra.mxu1 %v1755_v21  ;;  %v2193_v51 = vld [vmem:[#allocation4 + $0xc] sm:$0xf]  ;;  %v2192_v57 = vld [vmem:[#allocation4 + $0x4] sm:$0xf]  ;;  %v1668_v58 = vld [vmem:[#allocation4 + $0x10] sm:$0xf0]  ;;  %v2773_v61 = vor.u32 %v2194_v56, %v1666_v53  ;;  %v1863_v2 = vor.u32 %v2240_v47, %v1860_v48 }
  0x42   :  { %627 = vmatpush.bf16.msra.mxu2 %v1819_v22  ;;  %v2256_v59 = vld [vmem:[#allocation9 + $0x1e4] sm:$0xf]  ;;  %v1924_v60 = vld [vmem:[#allocation9 + $0x1e8] sm:$0xf0]  ;;  %v2775_v62 = vor.u32 %v2192_v57, %v1668_v58  ;;  %v2206_v1 = vld [vmem:[#allocation9 + $0x54] sm:$0xf]  ;;  %v2777_v6 = vor.u32 %v2193_v51, %v1676_v52 }
  0x43   :  { %641 = vmatpush.bf16.msra.mxu3 %v1883_v26  ;;  %v1724_v3 = vld [vmem:[#allocation9 + $0x58] sm:$0xf0]  ;;  %v2222_v4 = vld [vmem:[#allocation9 + $0xd4] sm:$0xf]  ;;  %v1927_v7 = vor.u32 %v2256_v59, %v1924_v60  ;;  %v2204_v14 = vld [vmem:[#allocation9 + $0x44] sm:$0xf] }
  0x44   :  { %600 = vmatpush.bf16.msra.mxu0 %v1683_v33  ;;  %v1788_v5 = vld [vmem:[#allocation9 + $0xd8] sm:$0xf0]  ;;  %v2238_v8 = vld [vmem:[#allocation9 + $0x154] sm:$0xf]  ;;  %v1727_v12 = vor.u32 %v2206_v1, %v1724_v3  ;;  %v1716_v16 = vld [vmem:[#allocation9 + $0x48] sm:$0xf0] }
  0x45   :  { %614 = vmatpush.bf16.msra.mxu1 %v1747_v37  ;;  %v1852_v9 = vld [vmem:[#allocation9 + $0x158] sm:$0xf0]  ;;  %v2254_v10 = vld [vmem:[#allocation9 + $0x1d4] sm:$0xf]  ;;  %v1791_v13 = vor.u32 %v2222_v4, %v1788_v5  ;;  %v2220_v17 = vld [vmem:[#allocation9 + $0xc4] sm:$0xf]  ;;  %v1719_v24 = vor.u32 %v2204_v14, %v1716_v16 }
  0x46   :  { %628 = vmatpush.bf16.msra.mxu2 %v1811_v38  ;;  %v1916_v11 = vld [vmem:[#allocation9 + $0x1d8] sm:$0xf0]  ;;  %v1855_v15 = vor.u32 %v2238_v8, %v1852_v9  ;;  %v1780_v18 = vld [vmem:[#allocation9 + $0xc8] sm:$0xf0]  ;;  %v2236_v20 = vld [vmem:[#allocation9 + $0x144] sm:$0xf] }
  0x47   :  { %642 = vmatpush.bf16.msra.mxu3 %v1875_v50  ;;  %601 = vmatmul.bf16.vlgmr.msra.gmra.mxu0 %v2773_v61  ;;  %v1919_v19 = vor.u32 %v2254_v10, %v1916_v11  ;;  %v1844_v21 = vld [vmem:[#allocation9 + $0x148] sm:$0xf0]  ;;  %v2252_v22 = vld [vmem:[#allocation9 + $0x1c4] sm:$0xf]  ;;  %v1783_v25 = vor.u32 %v2220_v17, %v1780_v18  ;;  %v2202_v26 = vld [vmem:[#allocation9 + $0x34] sm:$0xf] }
  0x48   :  { %649 = vmatpush.bf16.msrb.mxu0 %v1743_v44  ;;  %615 = vmatmul.bf16.vlgmr.msra.gmra.mxu1 %v2775_v62  ;;  %v1908_v23 = vld [vmem:[#allocation9 + $0x1c8] sm:$0xf0]  ;;  %v1708_v27 = vld [vmem:[#allocation9 + $0x38] sm:$0xf0]  ;;  %v1847_v28 = vor.u32 %v2236_v20, %v1844_v21  ;;  %v2218_v29 = vld [vmem:[#allocation9 + $0xb4] sm:$0xf] }
  0x49   :  { %663 = vmatpush.bf16.msrb.mxu1 %v1807_v45  ;;  %629 = vmatmul.bf16.vlgmr.msra.gmra.mxu2 %v2771_v55  ;;  %v1772_v30 = vld [vmem:[#allocation9 + $0xb8] sm:$0xf0]  ;;  %v2234_v31 = vld [vmem:[#allocation9 + $0x134] sm:$0xf]  ;;  %v1911_v32 = vor.u32 %v2252_v22, %v1908_v23  ;;  %v2783_v36 = vld [vmem:[#allocation9 + $0x24] sm:$0xf]  ;;  %v1711_v39 = vor.u32 %v2202_v26, %v1708_v27 }
  0x4a   :  { %677 = vmatpush.bf16.msrb.mxu2 %v1871_v49  ;;  %643 = vmatmul.bf16.vlgmr.msra.gmra.mxu3 %v2777_v6  ;;  %v1836_v33 = vld [vmem:[#allocation9 + $0x138] sm:$0xf0]  ;;  %v2250_v34 = vld [vmem:[#allocation9 + $0x1b4] sm:$0xf]  ;;  %v2785_v37 = vld [vmem:[#allocation9 + $0x28] sm:$0xf0]  ;;  %v1775_v40 = vor.u32 %v2218_v29, %v1772_v30 }
  0x4b   :  { %691 = vmatpush.bf16.msrb.mxu3 %v1935_v54  ;;  %v1900_v35 = vld [vmem:[#allocation9 + $0x1b8] sm:$0xf0]  ;;  %v2787_v38 = vld [vmem:[#allocation9 + $0xa4] sm:$0xf]  ;;  %v2789_v41 = vld [vmem:[#allocation9 + $0xa8] sm:$0xf0]  ;;  %v1839_v44 = vor.u32 %v2234_v31, %v1836_v33  ;;  %v1703_v8 = vor.u32 %v2783_v36, %v2785_v37 }
  0x4c   :  { %650 = vmatpush.bf16.msrb.mxu0 %v1735_v63  ;;  %v2791_v42 = vld [vmem:[#allocation9 + $0x124] sm:$0xf]  ;;  %v2793_v43 = vld [vmem:[#allocation9 + $0x128] sm:$0xf0]  ;;  %v2799_v47 = vld [vmem:[#allocation9 + $0x14] sm:$0xf]  ;;  %v1903_v53 = vor.u32 %v2250_v34, %v1900_v35  ;;  %v1767_v9 = vor.u32 %v2787_v38, %v2789_v41 }
  0x4d   :  { %664 = vmatpush.bf16.msrb.mxu1 %v1799_v0  ;;  %v2795_v45 = vld [vmem:[#allocation9 + $0x1a4] sm:$0xf]  ;;  %v2797_v46 = vld [vmem:[#allocation9 + $0x1a8] sm:$0xf0]  ;;  %v2801_v48 = vld [vmem:[#allocation9 + $0x18] sm:$0xf0]  ;;  %v1831_v18 = vor.u32 %v2791_v42, %v2793_v43 }
  0x4e   :  { %678 = vmatpush.bf16.msrb.mxu2 %v1863_v2  ;;  %v2803_v49 = vld [vmem:[#allocation9 + $0x94] sm:$0xf]  ;;  %v2805_v50 = vld [vmem:[#allocation9 + $0x98] sm:$0xf0]  ;;  %v2815_v57 = vld [vmem:[#allocation9 + $0x4] sm:$0xf]  ;;  %v1895_v23 = vor.u32 %v2795_v45, %v2797_v46 }
  0x4f   :  { %692 = vmatpush.bf16.msrb.mxu3 %v1927_v7  ;;  %v2807_v51 = vld [vmem:[#allocation9 + $0x114] sm:$0xf]  ;;  %v2809_v52 = vld [vmem:[#allocation9 + $0x118] sm:$0xf0]  ;;  %v2817_v58 = vld [vmem:[#allocation9 + $0x8] sm:$0xf0] }
  0x50   :  { %651 = vmatpush.bf16.msrb.mxu0 %v1727_v12  ;;  %v2811_v54 = vld [vmem:[#allocation9 + $0x194] sm:$0xf]  ;;  %v2813_v56 = vld [vmem:[#allocation9 + $0x198] sm:$0xf0]  ;;  %v2819_v59 = vld [vmem:[#allocation9 + $0x84] sm:$0xf]  ;;  %v1823_v26 = vor.u32 %v2807_v51, %v2809_v52 }
  0x51   :  { %665 = vmatpush.bf16.msrb.mxu1 %v1791_v13  ;;  %v2821_v60 = vld [vmem:[#allocation9 + $0x88] sm:$0xf0]  ;;  %v2823_v63 = vld [vmem:[#allocation9 + $0x104] sm:$0xf]  ;;  %v2827_v1 = vld [vmem:[#allocation13 + $0x70] sm:$0xf]  ;;  %v1887_v31 = vor.u32 %v2811_v54, %v2813_v56 }
  0x52   :  { %679 = vmatpush.bf16.msrb.mxu2 %v1855_v15  ;;  %v2825_v0 = vld [vmem:[#allocation9 + $0x108] sm:$0xf0]  ;;  %v2829_v2 = vld [vmem:[#allocation13 + $0x74] sm:$0xf0]  ;;  %v2831_v3 = vld [vmem:[#allocation13 + $0x74] sm:$0xf] }
  0x53   :  { %693 = vmatpush.bf16.msrb.mxu3 %v1919_v19  ;;  %v2833_v4 = vld [vmem:[#allocation13 + $0x78] sm:$0xf0]  ;;  %v2835_v5 = vld [vmem:[#allocation9 + $0x184] sm:$0xf]  ;;  %v2837_v7 = vld [vmem:[#allocation9 + $0x188] sm:$0xf0] }
  0x54   :  { %652 = vmatpush.bf16.msrb.mxu0 %v1719_v24  ;;  %v2843_v10 = vld [vmem:[#allocation13 + $0x60] sm:$0xf]  ;;  %v2845_v11 = vld [vmem:[#allocation13 + $0x64] sm:$0xf0]  ;;  %v2847_v12 = vld [vmem:[#allocation13 + $0x64] sm:$0xf]  ;;  %v1695_v24 = vor.u32 %v2799_v47, %v2801_v48 }
  0x55   :  { %666 = vmatpush.bf16.msrb.mxu1 %v1783_v25  ;;  %v2849_v13 = vld [vmem:[#allocation13 + $0x68] sm:$0xf0]  ;;  %v2851_v14 = vld [vmem:[#allocation13 + $0x50] sm:$0xf]  ;;  %v2853_v15 = vld [vmem:[#allocation13 + $0x54] sm:$0xf0]  ;;  %v1759_v25 = vor.u32 %v2803_v49, %v2805_v50 }
  0x56   :  { %680 = vmatpush.bf16.msrb.mxu2 %v1847_v28  ;;  %v2855_v16 = vld [vmem:[#allocation13 + $0x54] sm:$0xf]  ;;  %v2857_v17 = vld [vmem:[#allocation13 + $0x58] sm:$0xf0]  ;;  %v2861_v19 = vld [vmem:[#allocation13 + $0x40] sm:$0xf] }
  0x57   :  { %694 = vmatpush.bf16.msrb.mxu3 %v1911_v32  ;;  %v2863_v20 = vld [vmem:[#allocation13 + $0x44] sm:$0xf0]  ;;  %v2865_v21 = vld [vmem:[#allocation13 + $0x44] sm:$0xf]  ;;  %v2867_v22 = vld [vmem:[#allocation13 + $0x48] sm:$0xf0] }
  0x58   :  { %653 = vmatpush.bf16.msrb.mxu0 %v1711_v39  ;;  %v2877_v27 = vld [vmem:[#allocation13 + $0x30] sm:$0xf]  ;;  %v2879_v28 = vld [vmem:[#allocation13 + $0x34] sm:$0xf0]  ;;  %v2881_v29 = vld [vmem:[#allocation13 + $0x34] sm:$0xf] }
  0x59   :  { %667 = vmatpush.bf16.msrb.mxu1 %v1775_v40  ;;  %v2883_v30 = vld [vmem:[#allocation13 + $0x38] sm:$0xf0]  ;;  %v2893_v35 = vld [vmem:[#allocation13 + $0x20] sm:$0xf]  ;;  %v2895_v36 = vld [vmem:[#allocation13 + $0x24] sm:$0xf0] }
  0x5a   :  { %681 = vmatpush.bf16.msrb.mxu2 %v1839_v44  ;;  %v2897_v37 = vld [vmem:[#allocation13 + $0x24] sm:$0xf]  ;;  %v2905_v41 = vld [vmem:[#allocation13 + $0x28] sm:$0xf0]  ;;  %v2907_v42 = vld [vmem:[#allocation13 + $0x10] sm:$0xf] }
  0x5b   :  { %695 = vmatpush.bf16.msrb.mxu3 %v1903_v53  ;;  %3150 = vst [vmem:[#allocation25_spill] sm:$0xff] %v2907_v42  ;;  %v2909_v43 = vld [vmem:[#allocation13 + $0x14] sm:$0xf0]  ;;  %v2919_v48 = vld [vmem:[#allocation13 + $0x14] sm:$0xf]  ;;  %v2325_v50 = vld [vmem:[#allocation7] sm:$0xff]  }
  0x5c   :  { %654 = vmatpush.bf16.msrb.mxu0 %v1703_v8  ;;  %3151 = vst [vmem:[#allocation26_spill] sm:$0xff] %v2909_v43  ;;  %v2921_v49 = vld [vmem:[#allocation13 + $0x18] sm:$0xf0]  ;;  %v2927_v53 = vld [vmem:[#allocation13] sm:$0xf]  ;;  %v2326_v56 = vunpack.c.l.bf16 %v2325_v50  ;;  %v2327_v8 = vunpack.c.h.bf16 %v2325_v50  ;;  %v2389_v45 = vld [vmem:[#allocation7 + $0x10] sm:$0xff]  }
  0x5d   :  { %668 = vmatpush.bf16.msrb.mxu1 %v1767_v9  ;;  %3152 = vst [vmem:[#allocation27_spill] sm:$0xff] %v2919_v48  ;;  %v2929_v54 = vld [vmem:[#allocation13 + $0x4] sm:$0xf0]  ;;  %v2941_v47 = vld [vmem:[#allocation13 + $0x4] sm:$0xf]  ;;  %v2390_v44 = vld [vmem:[#allocation7 + $0x18] sm:$0xff]   ;;  %v2335_v38 = vunpack.c.h.bf16 %v2389_v45 }
  0x5e   :  { %682 = vmatpush.bf16.msrb.mxu2 %v1831_v18  ;;  %3153 = vst [vmem:[#allocation28_spill] sm:$0xff] %v2921_v49  ;;  %v2931_v9 = vld [vmem:[#allocation7 + $0x8] sm:$0xff]   ;;  %v2391_v52 = vld [vmem:[#allocation7 + $0x20] sm:$0xff]   ;;  %v2393_v50 = vld [vmem:[#allocation7 + $0x30] sm:$0xff]   ;;  %v2338_v18 = vunpack.c.l.bf16 %v2390_v44  ;;  %vm957_vm0 = vcmask 1041409   ;;  %vm959_vm1 = vcmask 1042434  }
  0x5f   :  { %696 = vmatpush.bf16.msrb.mxu3 %v1895_v23  ;;  %3154 = vst [vmem:[#allocation29_spill] sm:$0xff] %v2927_v53  ;;  %v2943_v46 = vld [vmem:[#allocation13 + $0x8] sm:$0xf0]  ;;  %v2330_v51 = vunpack.c.l.bf16 %v2931_v9  ;;  %v2394_v34 = vld [vmem:[#allocation7 + $0x38] sm:$0xff]   ;;  %v2955_v33 = vld [vmem:[#allocation7 + $0x40] sm:$0xff]   ;;  %v2339_v23 = vunpack.c.h.bf16 %v2390_v44  ;;  %v2342_v32 = vunpack.c.l.bf16 %v2391_v52  ;;  %v2343_v49 = vunpack.c.h.bf16 %v2391_v52  ;;  %s1647_s14 = sshll.u32 %s3141_s12, 4  ;;  %s1648_s14 = int_to_ptr.hbm [resolvable:$true] %s1647_s14 }
  0x60   :  { %3155 = vst [vmem:[#allocation30_spill] sm:$0xff] %v2929_v54  ;;  %655 = vmatpush.bf16.msrb.mxu0 %v1695_v24  ;;  %v2392_v40 = vld [vmem:[#allocation7 + $0x28] sm:$0xff]   ;;  %v2331_v24 = vunpack.c.h.bf16 %v2931_v9  ;;  %v2959_v54 = vld [vmem:[#allocation7 + $0x50] sm:$0xff]   ;;  %v2961_v9 = vld [vmem:[#allocation7 + $0x58] sm:$0xff]   ;;  %v2351_v44 = vunpack.c.h.bf16 %v2393_v50  ;;  %v2354_v42 = vunpack.c.l.bf16 %v2394_v34  ;;  %v2355_v43 = vunpack.c.h.bf16 %v2394_v34 }
  0x61   :  { %3156 = vst [vmem:[#allocation31_spill] sm:$0xff] %v2941_v47  ;;  %669 = vmatpush.bf16.msrb.mxu1 %v1759_v25  ;;  %v2334_v25 = vunpack.c.l.bf16 %v2389_v45  ;;  %v2957_v53 = vld [vmem:[#allocation7 + $0x48] sm:$0xff]   ;;  %v2346_v48 = vunpack.c.l.bf16 %v2392_v40  ;;  %v2347_v39 = vunpack.c.h.bf16 %v2392_v40  ;;  %v2963_v45 = vld [vmem:[#allocation7 + $0x60] sm:$0xff]   ;;  %v3158_v47 = vor.u32 %v2815_v57, %v2817_v58 }
  0x62   :  { %3157 = vst [vmem:[#allocation32_spill] sm:$0xff] %v2943_v46  ;;  %683 = vmatpush.bf16.msrb.mxu2 %v1823_v26  ;;  %v777_v26 = vadd.f32 %v2327_v8, %v2326_v56  ;;  %v2350_v46 = vunpack.c.l.bf16 %v2393_v50  ;;  %v2358_v52 = vunpack.c.l.bf16 %v2955_v33  ;;  %v2972_v56 = vld [vmem:[#allocation7 + $0x68] sm:$0xff]   ;;  %v3160_v40 = vor.u32 %v2823_v63, %v2825_v0 }
  0x63   :  { %697 = vmatpush.bf16.msrb.mxu3 %v1887_v31  ;;  %v3159_v31 = vor.u32 %v2819_v59, %v2821_v60  ;;  %v3161_v8 = vor.u32 %v2829_v2, %v2827_v1  ;;  %v2359_v57 = vunpack.c.h.bf16 %v2955_v33  ;;  %v2362_v58 = vunpack.c.l.bf16 %v2957_v53 }
  0x64   :  { %656 = vmatpush.bf16.msrb.mxu0 %v3158_v47  ;;  %v2363_v59 = vunpack.c.h.bf16 %v2957_v53  ;;  %v2366_v60 = vunpack.c.l.bf16 %v2959_v54  ;;  %v3162_v34 = vor.u32 %v2831_v3, %v2833_v4  ;;  %v3163_v63 = vor.u32 %v2835_v5, %v2837_v7 }
  0x65   :  { %670 = vmatpush.bf16.msrb.mxu1 %v3159_v31  ;;  %v2367_v0 = vunpack.c.h.bf16 %v2959_v54  ;;  %v2370_v1 = vunpack.c.l.bf16 %v2961_v9  ;;  %v2371_v2 = vunpack.c.h.bf16 %v2961_v9  ;;  %v2374_v47 = vunpack.c.l.bf16 %v2963_v45  ;;  %v2282_v9 = vld [vmem:[#allocation10 + $0x30] sm:$0xff] }
  0x66   :  { %684 = vmatpush.bf16.msrb.mxu2 %v3160_v40  ;;  %v778_v4 = vrot.slane %v777_v26, 4  ;;  %v784_v31 = vadd.f32 %v2331_v24, %v2330_v51  ;;  %v791_v5 = vadd.f32 %v2335_v38, %v2334_v25  ;;  %v798_v7 = vadd.f32 %v2339_v23, %v2338_v18 }
  0x67   :  { %698 = vmatpush.bf16.msrb.mxu3 %v3163_v63  ;;  %657 = vmatmul.bf16.vlgmr.msrb.gmra.mxu0 %v2773_v61  ;;  %v805_v40 = vadd.f32 %v2343_v49, %v2342_v32  ;;  %v819_v63 = vadd.f32 %v2351_v44, %v2350_v46  ;;  %v826_v50 = vadd.f32 %v2355_v43, %v2354_v42  ;;  %vm961_vm2 = vcmask 1043459  }
  0x68   :  { %1060 = vmatpush.bf16.msra.mxu0 %v3161_v8  ;;  %671 = vmatmul.bf16.vlgmr.msrb.gmra.mxu1 %v2775_v62  ;;  %v812_v8 = vadd.f32 %v2347_v39, %v2346_v48  ;;  %v779_v61 = vadd.f32 %v778_v4, %v777_v26  ;;  %v785_v62 = vrot.slane %v784_v31, 4  ;;  %v3165_v3 = vor.u32 %v2847_v12, %v2849_v13  ;;  %v2401_v4 = vld [vmem:[#allocation7 + $0x70] sm:$0xff]  }
  0x69   :  { %1074 = vmatpush.bf16.msra.mxu1 %v3162_v34  ;;  %685 = vmatmul.bf16.vlgmr.msrb.gmra.mxu2 %v2771_v55  ;;  %v3164_v34 = vor.u32 %v2845_v11, %v2843_v10  ;;  %v792_v51 = vrot.slane %v791_v5, 4  ;;  %v799_v55 = vrot.slane %v798_v7, 4  ;;  %v806_v38 = vrot.slane %v805_v40, 4 }
  0x6a   :  { %699 = vmatmul.bf16.vlgmr.msrb.gmra.mxu3 %v2777_v6  ;;  %v813_v18 = vrot.slane %v812_v8, 4  ;;  %v780_v32 = vrot.slane %v779_v61, 2  ;;  %v786_v39 = vadd.f32 %v785_v62, %v784_v31  ;;  %v820_v48 = vrot.slane %v819_v63, 4  ;;  %v2402_v31 = vld [vmem:[#allocation7 + $0x78] sm:$0xff]  }
  0x6b   :  { %v827_v6 = vrot.slane %v826_v50, 4  ;;  %v793_v49 = vadd.f32 %v792_v51, %v791_v5  ;;  %v800_v23 = vadd.f32 %v799_v55, %v798_v7  ;;  %v807_v10 = vadd.f32 %v806_v38, %v805_v40 }
  0x6c   :  { %1061 = vmatpush.bf16.msra.mxu0 %v3164_v34  ;;  %v814_v11 = vadd.f32 %v813_v18, %v812_v8  ;;  %v3166_v46 = vor.u32 %v2853_v15, %v2851_v14  ;;  %v781_v42 = vadd.f32 %v780_v32, %v779_v61  ;;  %v787_v43 = vrot.slane %v786_v39, 2 }
  0x6d   :  { %1075 = vmatpush.bf16.msra.mxu1 %v3165_v3  ;;  %v821_v12 = vadd.f32 %v820_v48, %v819_v63  ;;  %v828_v13 = vadd.f32 %v827_v6, %v826_v50  ;;  %v3167_v24 = vor.u32 %v2855_v16, %v2857_v17  ;;  %v794_v25 = vrot.slane %v793_v49, 2 }
  0x6e   :  { %v801_v26 = vrot.slane %v800_v23, 2  ;;  %v808_v44 = vrot.slane %v807_v10, 2  ;;  %v815_v3 = vrot.slane %v814_v11, 2  ;;  %v782_v5 = vrot.slane %v781_v42, 1 }
  0x6f   :  { %v788_v7 = vadd.f32 %v787_v43, %v786_v39  ;;  %v822_v40 = vrot.slane %v821_v12, 2  ;;  %v829_v8 = vrot.slane %v828_v13, 2  ;;  %v795_v14 = vadd.f32 %v794_v25, %v793_v49 }
  0x70   :  { %1062 = vmatpush.bf16.msra.mxu0 %v3166_v46  ;;  %v3012_v15 = vadd.f32 %v801_v26, %v800_v23  ;;  %v3014_v34 = vadd.f32 %v808_v44, %v807_v10  ;;  %v3016_v50 = vadd.f32 %v815_v3, %v814_v11  ;;  %v3168_v16 = vor.u32 %v2863_v20, %v2861_v19 }
  0x71   :  { %1076 = vmatpush.bf16.msra.mxu1 %v3167_v24  ;;  %v2379_v17 = vunpack.c.h.bf16 %v2972_v56  ;;  %v789_v61 = vrot.slane %v788_v7, 1  ;;  %v3022_v62 = vadd.f32 %v822_v40, %v821_v12  ;;  %v3024_v63 = vadd.f32 %v829_v8, %v828_v13 }
  0x72   :  { %v3169_v51 = vor.u32 %v2865_v21, %v2867_v22  ;;  %v2382_v55 = vunpack.c.l.bf16 %v2401_v4  ;;  %v2383_v38 = vunpack.c.h.bf16 %v2401_v4  ;;  %v2386_v18 = vunpack.c.l.bf16 %v2402_v31 }
  0x73   :  { %v796_v32 = vrot.slane %v795_v14, 1  ;;  %v2387_v39 = vunpack.c.h.bf16 %v2402_v31  ;;  %v3029_v48 = vadd.f32 %v782_v5, %v781_v42  ;;  %v803_v19 = vrot.slane %v3012_v15, 1 }
  0x74   :  { %1063 = vmatpush.bf16.msra.mxu0 %v3168_v16  ;;  %v833_v20 = vadd.f32 %v2359_v57, %v2358_v52  ;;  %v3036_v6 = vadd.f32 %v789_v61, %v788_v7  ;;  %v810_v49 = vrot.slane %v3014_v34, 1  ;;  %v817_v21 = vrot.slane %v3016_v50, 1  ;;  %v3176_v16 = vld [vmem:[#allocation26_spill] sm:$0xff] }
  0x75   :  { %1077 = vmatpush.bf16.msra.mxu1 %v3169_v51  ;;  %v824_v22 = vrot.slane %v3022_v62, 1  ;;  %v3170_v23 = vor.u32 %v2879_v28, %v2877_v27  ;;  %v3044_v10 = vadd.f32 %v796_v32, %v795_v14  ;;  %v831_v11 = vrot.slane %v3024_v63, 1  ;;  %v2281_v14 = vld [vmem:[#allocation10 + $0x28] sm:$0xff] }
  0x76   :  { %v834_v46 = vrot.slane %v833_v20, 4  ;;  %v840_v33 = vadd.f32 %v2363_v59, %v2362_v58  ;;  %v3171_v52 = vor.u32 %v2881_v29, %v2883_v30  ;;  %v847_v27 = vadd.f32 %v2367_v0, %v2366_v60  ;;  %v2283_v29 = vld [vmem:[#allocation10 + $0x38] sm:$0xff] }
  0x77   :  { %v854_v28 = vadd.f32 %v2371_v2, %v2370_v1  ;;  %v3172_v57 = vunpack.c.h.bf16 %v2963_v45  ;;  %v3173_v58 = vunpack.c.l.bf16 %v2972_v56  ;;  %v875_v43 = vadd.f32 %v2383_v38, %v2382_v55  ;;  %1251 = vmatpush.bf16.msra.mxu2 %v2283_v29  ;;  %v3179_v38 = vld [vmem:[#allocation27_spill] sm:$0xff]  ;;  %v3182_v29 = vld [vmem:[#allocation30_spill] sm:$0xff] }
  0x78   :  { %1064 = vmatpush.bf16.msra.mxu0 %v3170_v23  ;;  %v835_v30 = vadd.f32 %v834_v46, %v833_v20  ;;  %v841_v42 = vrot.slane %v840_v33, 4  ;;  %v882_v12 = vadd.f32 %v2387_v39, %v2386_v18  ;;  %v848_v54 = vrot.slane %v847_v27, 4  ;;  %v3180_v18 = vld [vmem:[#allocation28_spill] sm:$0xff] }
  0x79   :  { %1078 = vmatpush.bf16.msra.mxu1 %v3171_v52  ;;  %v861_v53 = vadd.f32 %v3172_v57, %v2374_v47  ;;  %v868_v59 = vadd.f32 %v2379_v17, %v3173_v58  ;;  %v855_v60 = vrot.slane %v854_v28, 4  ;;  %v3174_v1 = vor.u32 %v2895_v36, %v2893_v35  ;;  %v3177_v17 = vld [vmem:[#allocation25_spill] sm:$0xff] }
  0x7a   :  { %v836_v45 = vrot.slane %v835_v30, 2  ;;  %v842_v2 = vadd.f32 %v841_v42, %v840_v33  ;;  %v876_v47 = vrot.slane %v875_v43, 4  ;;  %v883_v56 = vrot.slane %v882_v12, 4 }
  0x7b   :  { %v862_v0 = vrot.slane %v861_v53, 4  ;;  %v869_v13 = vrot.slane %v868_v59, 4  ;;  %v3175_v24 = vor.u32 %v2897_v37, %v2905_v41  ;;  %v849_v25 = vadd.f32 %v848_v54, %v847_v27  ;;  %1252 = vmatpush.bf16.msra.mxu2 %v2282_v9 }
  0x7c   :  { %1065 = vmatpush.bf16.msra.mxu0 %v3174_v1  ;;  %v856_v26 = vadd.f32 %v855_v60, %v854_v28  ;;  %v837_v4 = vadd.f32 %v836_v45, %v835_v30  ;;  %v843_v31 = vrot.slane %v842_v2, 2  ;;  %v877_v5 = vadd.f32 %v876_v47, %v875_v43  ;;  %v3183_v30 = vld [vmem:[#allocation29_spill] sm:$0xff] }
  0x7d   :  { %1079 = vmatpush.bf16.msra.mxu1 %v3175_v24  ;;  %v863_v44 = vadd.f32 %v862_v0, %v861_v53  ;;  %v870_v3 = vadd.f32 %v869_v13, %v868_v59  ;;  %v884_v7 = vadd.f32 %v883_v56, %v882_v12  ;;  %v850_v40 = vrot.slane %v849_v25, 2  ;;  %v3185_v0 = vld [vmem:[#allocation31_spill] sm:$0xff]  ;;  %v3186_v13 = vld [vmem:[#allocation32_spill] sm:$0xff] }
  0x7e   :  { %v857_v8 = vrot.slane %v856_v26, 2  ;;  %v3178_v61 = vor.u32 %v3176_v16, %v3177_v17  ;;  %v838_v37 = vrot.slane %v837_v4, 1  ;;  %v844_v41 = vadd.f32 %v843_v31, %v842_v2 }
  0x7f   :  { %v864_v35 = vrot.slane %v863_v44, 2  ;;  %v871_v36 = vrot.slane %v870_v3, 2  ;;  %v878_v51 = vrot.slane %v877_v5, 2  ;;  %v885_v55 = vrot.slane %v884_v7, 2  ;;  %1253 = vmatpush.bf16.msra.mxu2 %v2281_v14 }
  0x80   :  { %1066 = vmatpush.bf16.msra.mxu0 %v3178_v61  ;;  %v3181_v32 = vor.u32 %v3179_v38, %v3180_v18  ;;  %v851_v39 = vadd.f32 %v850_v40, %v849_v25  ;;  %v858_v20 = vadd.f32 %v857_v8, %v856_v26  ;;  %v804_v33 = vadd.f32 %v803_v19, %v3012_v15 }
  0x81   :  { %v865_v23 = vadd.f32 %v864_v35, %v863_v44  ;;  %v872_v46 = vadd.f32 %v871_v36, %v870_v3  ;;  %v845_v52 = vrot.slane %v844_v41, 1  ;;  %v879_v27 = vadd.f32 %v878_v51, %v877_v5 }
  0x82   :  { %1080 = vmatpush.bf16.msra.mxu1 %v3181_v32  ;;  %v886_v28 = vadd.f32 %v885_v55, %v884_v7  ;;  %v852_v57 = vrot.slane %v851_v39, 1  ;;  %v859_v53 = vrot.slane %v858_v20, 1  ;;  %v3184_v42 = vor.u32 %v3182_v29, %v3183_v30 }
  0x83   :  { %v866_v58 = vrot.slane %v865_v23, 1  ;;  %v873_v59 = vrot.slane %v872_v46, 1  ;;  %v839_v43 = vadd.f32 %v838_v37, %v837_v4  ;;  %v846_v12 = vadd.f32 %v845_v52, %v844_v41 }
  0x84   :  { %1067 = vmatpush.bf16.msra.mxu0 %v3184_v42  ;;  %v880_v54 = vrot.slane %v879_v27, 1  ;;  %v887_v60 = vrot.slane %v886_v28, 1  ;;  %v3187_v9 = vor.u32 %v3185_v0, %v3186_v13  ;;  %v811_v15 = vadd.f32 %v810_v49, %v3014_v34  ;;  %v2277_v0 = vld [vmem:[#allocation10 + $0x8] sm:$0xff]  ;;  %v2290_v13 = vld [vmem:[#allocation10 + $0x70] sm:$0xff] }
  0x85   :  { %v818_v19 = vadd.f32 %v817_v21, %v3016_v50  ;;  %v825_v1 = vadd.f32 %v824_v22, %v3022_v62  ;;  %v853_v45 = vadd.f32 %v852_v57, %v851_v39  ;;  %v832_v2 = vadd.f32 %v831_v11, %v3024_v63 }
  0x86   :  { %1081 = vmatpush.bf16.msra.mxu1 %v3187_v9  ;;  %v860_v47 = vadd.f32 %v859_v53, %v858_v20  ;;  %v867_v56 = vadd.f32 %v866_v58, %v865_v23  ;;  %v874_v24 = vadd.f32 %v873_v59, %v872_v46  ;;  %v881_v25 = vadd.f32 %v880_v54, %v879_v27  ;;  %v2278_v54 = vld [vmem:[#allocation10 + $0x10] sm:$0xff]  ;;  %v2276_v9 = vld [vmem:[#allocation10] sm:$0xff] }
  0x87   :  { %v888_v26 = vadd.f32 %v887_v60, %v886_v28  ;;  %v893_v34 = vpack.c.bf16 %v3029_v48, %v3029_v48  ;;  %v894_v50 = vpack.c.bf16 %v3036_v6, %v3036_v6  ;;  %v895_v49 = vpack.c.bf16 %v3044_v10, %v3044_v10  ;;  %v2291_v60 = vld [vmem:[#allocation10 + $0x78] sm:$0xff] }
  0x88   :  { %v896_v62 = vpack.c.bf16 %v804_v33, %v804_v33  ;;  %v901_v21 = vpack.c.bf16 %v839_v43, %v839_v43  ;;  %v902_v22 = vpack.c.bf16 %v846_v12, %v846_v12  ;;  %v897_v44 = vpack.c.bf16 %v811_v15, %v811_v15  ;;  %v2280_v43 = vld [vmem:[#allocation10 + $0x20] sm:$0xff]  ;;  %v2279_v12 = vld [vmem:[#allocation10 + $0x18] sm:$0xff]  ;;  %1265 = vmatpush.bf16.msra.mxu3 %v2291_v60  ;;  %v2289_v15 = vld [vmem:[#allocation10 + $0x68] sm:$0xff] }
  0x89   :  { %v898_v3 = vpack.c.bf16 %v818_v19, %v818_v19  ;;  %v899_v63 = vpack.c.bf16 %v825_v1, %v825_v1  ;;  %v903_v11 = vpack.c.bf16 %v853_v45, %v853_v45  ;;  %v900_v4 = vpack.c.bf16 %v832_v2, %v832_v2  ;;  %1254 = vmatpush.bf16.msra.mxu2 %v2280_v43  ;;  %v2288_v2 = vld [vmem:[#allocation10 + $0x60] sm:$0xff]  ;;  %v2293_v43 = vld [vmem:[#allocation15 + $0x8] sm:$0xff] }
  0x8a   :  { %v904_v31 = vpack.c.bf16 %v860_v47, %v860_v47  ;;  %v905_v5 = vpack.c.bf16 %v867_v56, %v867_v56  ;;  %v906_v7 = vpack.c.bf16 %v874_v24, %v874_v24  ;;  %v907_v40 = vpack.c.bf16 %v881_v25, %v881_v25  ;;  %v3110_v25 = vld [vmem:[%s3132_s3] sm:$0x3] }
  0x8b   :  { %v908_v8 = vpack.c.bf16 %v888_v26, %v888_v26  ;;  %v941_v48 = vunpack.c.l.b16 %v893_v34  ;;  %v942_v35 = vunpack.c.l.b16 %v894_v50  ;;  %v943_v36 = vunpack.c.l.b16 %v895_v49  ;;  %v2287_v49 = vld [vmem:[#allocation10 + $0x58] sm:$0xff] }
  0x8c   :  { %v944_v6 = vunpack.c.l.b16 %v896_v62  ;;  %v949_v14 = vunpack.c.l.b16 %v901_v21  ;;  %v950_v16 = vunpack.c.l.b16 %v902_v22  ;;  %v945_v10 = vunpack.c.l.b16 %v897_v44  ;;  %1266 = vmatpush.bf16.msra.mxu3 %v2290_v13  ;;  %v2299_v62 = vld [vmem:[#allocation15 + $0x38] sm:$0xff]  ;;  %v2300_v13 = vld [vmem:[#allocation15 + $0x40] sm:$0xff] }
  0x8d   :  { %v946_v17 = vunpack.c.l.b16 %v898_v3  ;;  %v947_v61 = vunpack.c.l.b16 %v899_v63  ;;  %v951_v37 = vunpack.c.l.b16 %v903_v11  ;;  %v952_v41 = vunpack.c.l.b16 %v904_v31  ;;  %1255 = vmatpush.bf16.msra.mxu2 %v2279_v12  ;;  %v2307_v21 = vld [vmem:[#allocation15 + $0x78] sm:$0xff]  ;;  %1433 = vmatpush.bf16.msrb.mxu0 %v2299_v62  ;;  %v2286_v3 = vld [vmem:[#allocation10 + $0x50] sm:$0xff] }
  0x8e   :  { %v948_v51 = vunpack.c.l.b16 %v900_v4  ;;  %v953_v55 = vunpack.c.l.b16 %v905_v5  ;;  %v958_v38 = vsel %vm957_vm0, %v942_v35, %v941_v48  ;;  %vm963_vm3 = vcmask 1044484   ;;  %1447 = vmatpush.bf16.msrb.mxu1 %v2307_v21  ;;  %v2306_v48 = vld [vmem:[#allocation15 + $0x70] sm:$0xff]  ;;  %v2285_v35 = vld [vmem:[#allocation10 + $0x48] sm:$0xff] }
  0x8f   :  { %v954_v18 = vunpack.c.l.b16 %v906_v7  ;;  %v960_v32 = vsel %vm959_vm1, %v943_v36, %v958_v38  ;;  %vm965_vm4 = vcmask 1045509   ;;  %v971_v39 = vsel %vm957_vm0, %v950_v16, %v949_v14  ;;  %v2305_v14 = vld [vmem:[#allocation15 + $0x68] sm:$0xff] }
  0x90   :  { %v955_v20 = vunpack.c.l.b16 %v907_v40  ;;  %v962_v23 = vsel %vm961_vm2, %v944_v6, %v960_v32  ;;  %vm967_vm5 = vcmask 1046534   ;;  %v972_v46 = vsel %vm959_vm1, %v951_v37, %v971_v39  ;;  %1267 = vmatpush.bf16.msra.mxu3 %v2289_v15  ;;  %v2297_v6 = vld [vmem:[#allocation15 + $0x28] sm:$0xff]  ;;  %v1285_v15 = vld [vmem:[%s3136_s7] sm:$0x3] }
  0x91   :  { %v956_v33 = vunpack.c.l.b16 %v908_v8  ;;  %v964_v52 = vsel %vm963_vm3, %v945_v10, %v962_v23  ;;  %vm969_vm6 = vcmask 1047559   ;;  %v973_v27 = vsel %vm961_vm2, %v952_v41, %v972_v46  ;;  %1256 = vmatpush.bf16.msra.mxu2 %v2278_v54  ;;  %v2298_v8 = vld [vmem:[#allocation15 + $0x30] sm:$0xff]  ;;  %v2284_v10 = vld [vmem:[#allocation10 + $0x40] sm:$0xff]  ;;  %v2301_v12 = vld [vmem:[#allocation15 + $0x48] sm:$0xff] }
  0x92   :  { %v966_v28 = vsel %vm965_vm4, %v946_v17, %v964_v52  ;;  %v974_v57 = vsel %vm963_vm3, %v953_v55, %v973_v27  ;;  %v1105_v44 = vperm.slane %v3110_v25, 0  ;;  %1434 = vmatpush.bf16.msrb.mxu0 %v2298_v8  ;;  %1448 = vmatpush.bf16.msrb.mxu1 %v2306_v48  ;;  %v2296_v17 = vld [vmem:[#allocation15 + $0x20] sm:$0xff]  ;;  %v1106_v23 = vperm.slane %v3110_v25, 1  ;;  %v2303_v52 = vld [vmem:[#allocation15 + $0x58] sm:$0xff]  ;;  %v2309_v8 = vld [vmem:[#allocation16 + $0x8] sm:$0xff] }
  0x93   :  { %v968_v53 = vsel %vm967_vm5, %v947_v61, %v966_v28  ;;  %v975_v58 = vsel %vm965_vm4, %v954_v18, %v974_v57  ;;  %v2304_v61 = vld [vmem:[#allocation15 + $0x60] sm:$0xff] }
  0x94   :  { %v970_v59 = vsel %vm969_vm6, %v948_v51, %v968_v53  ;;  %v976_v29 = vsel %vm967_vm5, %v955_v20, %v975_v58  ;;  %1268 = vmatpush.bf16.msra.mxu3 %v2288_v2  ;;  %v2294_v58 = vld [vmem:[#allocation15 + $0x10] sm:$0xff] }
  0x95   :  { %v977_v30 = vsel %vm969_vm6, %v956_v33, %v976_v29  ;;  %1257 = vmatpush.bf16.msra.mxu2 %v2277_v0  ;;  %v2295_v33 = vld [vmem:[#allocation15 + $0x18] sm:$0xff]  ;;  %v2292_v0 = vld [vmem:[#allocation15] sm:$0xff] }
  0x96   :  { %v978_v42 = vpack.c.b16 %v977_v30, %v970_v59  ;;  %1435 = vmatpush.bf16.msrb.mxu0 %v2297_v6  ;;  %1449 = vmatpush.bf16.msrb.mxu1 %v2305_v14  ;;  %v2302_v59 = vld [vmem:[#allocation15 + $0x50] sm:$0xff]  ;;  %v2308_v6 = vld [vmem:[#allocation16] sm:$0xff] }
  0x98   :  { %1068 = vmatmul.bf16.vlgmr.msra.gmra.mxu0 %v978_v42  ;;  %1082 = vmatmul.bf16.vlgmr.msra.gmra.mxu1 %v978_v42 }
  0x99   :  { %1258 = vmatpush.bf16.msra.mxu2 %v2276_v9  ;;  %1269 = vmatpush.bf16.msra.mxu3 %v2287_v49 }
  0x9a   :  { %1436 = vmatpush.bf16.msrb.mxu0 %v2296_v17  ;;  %1450 = vmatpush.bf16.msrb.mxu1 %v2304_v61 }
  0x9d   :  { %1270 = vmatpush.bf16.msra.mxu3 %v2286_v3  ;;  %v2314_v3 = vld [vmem:[#allocation16 + $0x30] sm:$0xff] }
  0x9e   :  { %1437 = vmatpush.bf16.msrb.mxu0 %v2295_v33  ;;  %1451 = vmatpush.bf16.msrb.mxu1 %v2303_v52 }
  0xa1   :  { %1271 = vmatpush.bf16.msra.mxu3 %v2285_v35  ;;  %v2418_v35 = vld [vmem:[#allocation12] ss:$0 sm:$0xff] }
  0xa2   :  { %1438 = vmatpush.bf16.msrb.mxu0 %v2294_v58  ;;  %1452 = vmatpush.bf16.msrb.mxu1 %v2302_v59 }
  0xa5   :  { %1272 = vmatpush.bf16.msra.mxu3 %v2284_v10  ;;  %v2319_v10 = vld [vmem:[#allocation16 + $0x58] sm:$0xff] }
  0xa6   :  { %1439 = vmatpush.bf16.msrb.mxu0 %v2293_v43  ;;  %1453 = vmatpush.bf16.msrb.mxu1 %v2301_v12 }
  0xaa   :  { %1440 = vmatpush.bf16.msrb.mxu0 %v2292_v0  ;;  %1454 = vmatpush.bf16.msrb.mxu1 %v2300_v13 }
  0xc4   :  { %v602_v19 = vpop.f32.mrf.mxu0 }
  0xc5   :  { %v616_v1 = vpop.f32.mrf.mxu1 }
  0xc6   :  { %v617_v45 = vadd.f32 %v616_v1, %v602_v19  ;;  %v1287_v1 = vperm.slane %v1285_v15, 0 }
  0xcc   :  { %v630_v47 = vpop.f32.mrf.mxu2  ;;  %v604_v26 = vpop.f32.mrf.mxu0 }
  0xcd   :  { %v631_v56 = vadd.f32 %v630_v47, %v617_v45  ;;  %v644_v24 = vpop.f32.mrf.mxu3  ;;  %v618_v34 = vpop.f32.mrf.mxu1  ;;  %v1288_v45 = vperm.slane %v1285_v15, 1 }
  0xce   :  { %v619_v50 = vadd.f32 %v618_v34, %v604_v26 }
  0xcf   :  { %v645_v22 = vadd.f32 %v644_v24, %v631_v56 }
  0xd1   :  { %v1109_v4 = vadd.f32 %v1105_v44, %v645_v22 }
  0xd3   :  { %v1113_v7 = vmax.f32 %v1109_v4, 0.0  ;;  %v2323_v4 = vld [vmem:[#allocation16 + $0x78] sm:$0xff] }
  0xd4   :  { %v632_v63 = vpop.f32.mrf.mxu2  ;;  %1625 = vmatpush.bf16.msrb.mxu3 %v2323_v4 }
  0xd5   :  { %v633_v11 = vadd.f32 %v632_v63, %v619_v50  ;;  %v646_v31 = vpop.f32.mrf.mxu3  ;;  %v2313_v63 = vld [vmem:[#allocation16 + $0x28] sm:$0xff] }
  0xd7   :  { %v647_v5 = vadd.f32 %v646_v31, %v633_v11  ;;  %v2312_v11 = vld [vmem:[#allocation16 + $0x20] sm:$0xff]  ;;  %v2311_v31 = vld [vmem:[#allocation16 + $0x18] sm:$0xff] }
  0xd9   :  { %v1111_v40 = vadd.f32 %v1105_v44, %v647_v5  ;;  %v2315_v44 = vld [vmem:[#allocation16 + $0x38] sm:$0xff]  ;;  %v2322_v5 = vld [vmem:[#allocation16 + $0x70] sm:$0xff] }
  0xda   :  { %1611 = vmatpush.bf16.msrb.mxu2 %v2315_v44  ;;  %1626 = vmatpush.bf16.msrb.mxu3 %v2322_v5 }
  0xdb   :  { %v1115_v36 = vmax.f32 %v1111_v40, 0.0  ;;  %v2321_v40 = vld [vmem:[#allocation16 + $0x68] sm:$0xff] }
  0xdd   :  { %v1117_v16 = vpack.c.bf16 %v1115_v36, %v1113_v7  ;;  %v2310_v7 = vld [vmem:[#allocation16 + $0x10] sm:$0xff]  ;;  %v2320_v36 = vld [vmem:[#allocation16 + $0x60] sm:$0xff] }
  0xde   :  { %1612 = vmatpush.bf16.msrb.mxu2 %v2314_v3  ;;  %1627 = vmatpush.bf16.msrb.mxu3 %v2321_v40 }
  0xdf   :  { %1259 = vmatmul.bf16.vlgmr.msra.gmra.mxu2 %v1117_v16 }
  0xe2   :  { %1613 = vmatpush.bf16.msrb.mxu2 %v2313_v63  ;;  %1628 = vmatpush.bf16.msrb.mxu3 %v2320_v36 }
  0xe4   :  { %v658_v37 = vpop.f32.mrf.mxu0 }
  0xe5   :  { %v672_v41 = vpop.f32.mrf.mxu1 }
  0xe6   :  { %v673_v51 = vadd.f32 %v672_v41, %v658_v37  ;;  %1614 = vmatpush.bf16.msrb.mxu2 %v2312_v11  ;;  %1629 = vmatpush.bf16.msrb.mxu3 %v2319_v10  ;;  %v2318_v37 = vld [vmem:[#allocation16 + $0x50] sm:$0xff] }
  0xea   :  { %1615 = vmatpush.bf16.msrb.mxu2 %v2311_v31  ;;  %1630 = vmatpush.bf16.msrb.mxu3 %v2318_v37 }
  0xec   :  { %v686_v55 = vpop.f32.mrf.mxu2  ;;  %v660_v32 = vpop.f32.mrf.mxu0 }
  0xed   :  { %v687_v38 = vadd.f32 %v686_v55, %v673_v51  ;;  %v700_v18 = vpop.f32.mrf.mxu3  ;;  %v674_v39 = vpop.f32.mrf.mxu1 }
  0xee   :  { %v675_v46 = vadd.f32 %v674_v39, %v660_v32  ;;  %1616 = vmatpush.bf16.msrb.mxu2 %v2310_v7 }
  0xef   :  { %v701_v20 = vadd.f32 %v700_v18, %v687_v38  ;;  %v2317_v18 = vld [vmem:[#allocation16 + $0x48] sm:$0xff] }
  0xf0   :  { %1631 = vmatpush.bf16.msrb.mxu3 %v2317_v18 }
  0xf1   :  { %v1110_v28 = vadd.f32 %v1106_v23, %v701_v20 }
  0xf2   :  { %1617 = vmatpush.bf16.msrb.mxu2 %v2309_v8 }
  0xf3   :  { %v1114_v30 = vmax.f32 %v1110_v28, 0.0 }
  0xf4   :  { %v688_v27 = vpop.f32.mrf.mxu2 }
  0xf5   :  { %v689_v57 = vadd.f32 %v688_v27, %v675_v46  ;;  %v702_v53 = vpop.f32.mrf.mxu3  ;;  %v2419_v27 = vld [vmem:[%s3138_s9] ss:$0 sm:$0xff]  ;;  %s2663_s9 = smov [#allocation18]  }
  0xf6   :  { %1618 = vmatpush.bf16.msrb.mxu2 %v2308_v6  ;;  %s1645_s28 = sshll.u32 %s2663_s9, 4  ;;  %s1646_s28 = int_to_ptr.vmem [resolvable:$true] %s1645_s28 }
  0xf7   :  { %v703_v29 = vadd.f32 %v702_v53, %v689_v57 }
  0xf9   :  { %v1112_v42 = vadd.f32 %v1106_v23, %v703_v29  ;;  %v2316_v23 = vld [vmem:[#allocation16 + $0x40] sm:$0xff] }
  0xfa   :  { %1632 = vmatpush.bf16.msrb.mxu3 %v2316_v23 }
  0xfb   :  { %v1116_v54 = vmax.f32 %v1112_v42, 0.0 }
  0xfd   :  { %v1118_v60 = vpack.c.bf16 %v1116_v54, %v1114_v30 }
  0xff   :  { %1273 = vmatmul.bf16.vlgmr.msra.gmra.mxu3 %v1118_v60 }
 0x115   :  { %v1069_v9 = vpop.f32.mrf.mxu0  ;;  %v1083_v19 = vpop.f32.mrf.mxu1 }
 0x116   :  { %v1291_v2 = vadd.f32 %v1287_v1, %v1069_v9  ;;  %v1292_v47 = vadd.f32 %v1288_v45, %v1083_v19  ;;  %v2420_v19 = vld [vmem:[%s3140_s11] ss:$0 sm:$0xff] }
 0x118   :  { %v1295_v34 = vmax.f32 %v1291_v2, 0.0  ;;  %v1296_v50 = vmax.f32 %v1292_v47, 0.0 }
 0x11d   :  { %v1071_v56 = vpop.f32.mrf.mxu0  ;;  %v1085_v24 = vpop.f32.mrf.mxu1 }
 0x11e   :  { %v1293_v25 = vadd.f32 %v1287_v1, %v1071_v56  ;;  %v1294_v26 = vadd.f32 %v1288_v45, %v1085_v24 }
 0x120   :  { %v1297_v49 = vmax.f32 %v1293_v25, 0.0  ;;  %v1298_v62 = vmax.f32 %v1294_v26, 0.0 }
 0x122   :  { %v1299_v21 = vpack.c.bf16 %v1297_v49, %v1295_v34  ;;  %v1300_v22 = vpack.c.bf16 %v1298_v62, %v1296_v50 }
 0x124   :  { %1441 = vmatmul.bf16.vlgmr.msrb.gmra.mxu0 %v1299_v21  ;;  %1455 = vmatmul.bf16.vlgmr.msrb.gmra.mxu1 %v1300_v22 }
 0x162   :  { %v1260_v48 = vpop.f32.mrf.mxu2 }
 0x163   :  { %v1261_v16 = vadd.f32 %v2418_v35, %v1260_v48 }
 0x16a   :  { %v1262_v61 = vpop.f32.mrf.mxu2 }
 0x16b   :  { %v1263_v41 = vadd.f32 %v2418_v35, %v1262_v61 }
 0x182   :  { %v1274_v14 = vpop.f32.mrf.mxu3 }
 0x183   :  { %v1275_v17 = vadd.f32 %v1274_v14, %v1261_v16 }
 0x185   :  { %v1279_v51 = vmax.f32 %v1275_v17, 0.0 }
 0x187   :  { %v1463_v32 = vpack.c.bf16 %v1279_v51, %v1279_v51 }
 0x189   :  { %v1469_v46 = vunpack.c.l.b16 %v1463_v32 }
 0x18a   :  { %v1276_v55 = vpop.f32.mrf.mxu3 }
 0x18b   :  { %v1277_v38 = vadd.f32 %v1276_v55, %v1263_v41 }
 0x18d   :  { %v1280_v39 = vmax.f32 %v1277_v38, 0.0 }
 0x18f   :  { %v1464_v20 = vpack.c.bf16 %v1280_v39, %v1280_v39 }
 0x191   :  { %v1470_v33 = vunpack.c.l.b16 %v1464_v20 }
 0x193   :  { %v1471_v52 = vpack.c.b16 %v1470_v33, %v1469_v46 }
 0x195   :  { %1619 = vmatmul.bf16.vlgmr.msrb.gmra.mxu2 %v1471_v52 }
 0x1a1   :  { %v1442_v28 = vpop.f32.mrf.mxu0  ;;  %v1456_v57 = vpop.f32.mrf.mxu1 }
 0x1a2   :  { %v1443_v53 = vadd.f32 %v2419_v27, %v1442_v28 }
 0x1a4   :  { %v1457_v58 = vadd.f32 %v1456_v57, %v1443_v53 }
 0x1a6   :  { %v1461_v29 = vmax.f32 %v1457_v58, 0.0 }
 0x1a8   :  { %v1465_v12 = vpack.c.bf16 %v1461_v29, %v1461_v29 }
 0x1a9   :  { %v1444_v59 = vpop.f32.mrf.mxu0  ;;  %v1458_v42 = vpop.f32.mrf.mxu1 }
 0x1aa   :  { %v1445_v30 = vadd.f32 %v2419_v27, %v1444_v59  ;;  %v1475_v0 = vunpack.c.l.b16 %v1465_v12 }
 0x1ac   :  { %v1459_v43 = vadd.f32 %v1458_v42, %v1445_v30 }
 0x1ae   :  { %v1462_v54 = vmax.f32 %v1459_v43, 0.0 }
 0x1b0   :  { %v1466_v60 = vpack.c.bf16 %v1462_v54, %v1462_v54 }
 0x1b2   :  { %v1476_v13 = vunpack.c.l.b16 %v1466_v60 }
 0x1b4   :  { %v1477_v9 = vpack.c.b16 %v1476_v13, %v1475_v0 }
 0x1b6   :  { %1633 = vmatmul.bf16.vlgmr.msrb.gmra.mxu3 %v1477_v9 }
 0x218   :  { %v1620_v15 = vpop.f32.mrf.mxu2 }
 0x219   :  { %v1621_v1 = vadd.f32 %v2420_v19, %v1620_v15 }
 0x220   :  { %v1622_v47 = vpop.f32.mrf.mxu2 }
 0x221   :  { %v1623_v56 = vadd.f32 %v2420_v19, %v1622_v47 }
 0x239   :  { %v1634_v45 = vpop.f32.mrf.mxu3 }
 0x23a   :  { %v1635_v2 = vadd.f32 %v1634_v45, %v1621_v1 }
 0x23c   :  { %1639 = vst [vmem:[#allocation18] sm:$0xff] %v1635_v2 }
 0x241   :  { %v1636_v24 = vpop.f32.mrf.mxu3 }
 0x242   :  { %v1637_v25 = vadd.f32 %v1636_v24, %v1623_v56 }
 0x244   :  { %1640 = vst [vmem:[#allocation18 + $0x8] sm:$0xff] %v1637_v25 }
 0x245   :  { %1653 = dma.vmem_to_hbm [thread:$0]  %s1646_s28, 256, %s1648_s14, [#allocation6], %s2654_s21, %s2654_s21, %s2655_s22  }
 0x246   :  { %2647 = dma.done.wait [#allocation6], 256  }
 0x247   :  { %2648 = vsyncadd [#allocation6], 4294967040 }
 0x248   :  { %1658 = vsyncpa [#allocation5], 1 }
 0x249   :  { %1659 = vsyncpa [#allocation8], 1 }
 0x24a   :  { %1660 = vsyncpa [#allocation11], 1 }
 0x24b   :  { %1661 = vsyncpa [#allocation14], 1 }
 0x24c   :  { %1662 = vsyncpa [#allocation17], 1 }
 0x24d   :  { %1663 = vsyncpa [#allocation6], 1 }

</bundles_post_ra>
